<compile_context>
chip_gen: v5e
topology: v5e:2x2
jax: 0.10.0
libtpu: 0.0.40
codegen_flags: <defaults>
</compile_context>

<pallas_src>
import functools

import numpy as np
import jax
import jax.numpy as jnp
from jax.experimental import pallas as pl
from jax.experimental.pallas import tpu as pltpu


def _round_up(x, m):
    return ((x + m - 1) // m) * m


def _cdiv(a, b):
    return -(-a // b)


@functools.lru_cache(maxsize=None)
def _rfft_basis_np(L, F):
    """Real rfft bases: re = x @ C, im = x @ S   (C=cos, S=-sin)."""
    l = np.arange(L, dtype=np.float64)[:, None]
    k = np.arange(F, dtype=np.float64)[None, :]
    ang = 2.0 * np.pi * l * k / float(L)
    return np.cos(ang).astype(np.float32), (-np.sin(ang)).astype(np.float32)


@functools.lru_cache(maxsize=None)
def _irfft_basis_np(pf, n):
    """Real irfft bases: x[t] = sum_k re[k]*icos[k,t] + im[k]*isin[k,t]."""
    t = np.arange(n, dtype=np.float64)[None, :]
    k = np.arange(pf, dtype=np.float64)[:, None]
    ang = 2.0 * np.pi * k * t / float(n)
    w = np.where((k == 0) | (k == n // 2), 1.0, 2.0) / float(n)
    icos = (w * np.cos(ang)).astype(np.float32)
    isin = (-w * np.sin(ang)).astype(np.float32)
    return icos, isin  # each (pf, n)


def _freq_model_kernel(x_ref, wf_ref, bf_ref,
                       w1_ref, b1_ref, g_ref, be_ref, w2_ref, b2_ref,
                       al_ref, ah_ref, c_ref, out_ref, *, dh, d, e_layers):
    x = x_ref[...]                                                   # (tm, L)

    # Front end: rfft + masks + embeddings folded into one (L, d_model) matmul.
    hf = jnp.dot(x, wf_ref[...], preferred_element_type=jnp.float32) + bf_ref[...]
    h1 = hf[:, :dh]                                                  # (tm, dh)
    h2 = hf[:, dh:]                                                  # (tm, dh)

    def stage2(a, idx):
        # LayerNorm (E[a^2]-mu^2 variance) + ReLU + second linear.
        mu = jnp.mean(a, axis=-1, keepdims=True)
        var = jnp.mean(a * a, axis=-1, keepdims=True) - mu * mu
        a = (a - mu) * jax.lax.rsqrt(var + 1e-5) * g_ref[idx] + be_ref[idx]
        a = jnp.maximum(a, 0.0)
        return jnp.dot(a, w2_ref[idx], preferred_element_type=jnp.float32) + b2_ref[idx]

    def coupling_half(h_drive, pair, sub):
        # Fused first-stage matmul for the s/t subnets of this coupling half.
        a = (jnp.dot(h_drive, w1_ref[pair], preferred_element_type=jnp.float32)
             + b1_ref[pair])                                         # (tm, 2*d)
        s = stage2(a[:, :d], sub)        # scale_* already folded into W2/b2
        t = stage2(a[:, d:], sub + 1)
        return jnp.exp(jnp.clip(s, -5.0, 5.0)), t

    for layer in range(e_layers):
        e1, t1 = coupling_half(h2, 2 * layer + 0, 4 * layer + 0)
        h1 = h1 * e1 + t1
        e2, t2 = coupling_half(h1, 2 * layer + 1, 4 * layer + 2)
        h2 = h2 * e2 + t2

    # Frequency predictors pre-composed with the irfft basis -> lane-dense tile.
    out_ref[...] = (jnp.dot(h1, al_ref[...], preferred_element_type=jnp.float32)
                    + jnp.dot(h2, ah_ref[...], preferred_element_type=jnp.float32)
                    + c_ref[...])


def frequency_model_forward(x_enc, params, *, seq_len, pred_len, d_model,
                            e_layers, cutoff_ratio=0.5):
    """x_enc: (B, L, N) float32.  Returns prediction (B, target_len, N)."""
    B, L, N = x_enc.shape
    assert L == seq_len, f"Expected sequence length {seq_len}, got {L}"
    assert d_model % 2 == 0
    F = seq_len // 2 + 1
    cutoff = int(F * cutoff_ratio)
    pf = pred_len // 2 + 1
    target_len = (pf - 1) * 2
    dh = d_model // 2
    P_pad = _round_up(max(target_len, 1), 128)

    # ---- rows = (batch, channel); adaptive tile, >=2 grid steps when possible
    M = B * N
    x2d = jnp.transpose(x_enc, (0, 2, 1)).reshape(M, L).astype(jnp.float32)
    num_steps = _cdiv(M, 512)
    if M >= 16:
        num_steps = max(num_steps, 2)      # let both v7x TensorCores work
    tm = _round_up(_cdiv(M, num_steps), 8)
    M_pad = _round_up(M, tm)
    if M_pad != M:
        x2d = jnp.pad(x2d, ((0, M_pad - M), (0, 0)))
    grid = (M_pad // tm,)

    # ---- fold rfft basis + low/high masks into the embedding weights ---------
    C_np, S_np = _rfft_basis_np(L, F)                                # (L, F) each
    m_low = (np.arange(F) < cutoff).astype(np.float32)[None, :]
    m_high = 1.0 - m_low
    Cl, Sl = jnp.asarray(C_np * m_low), jnp.asarray(S_np * m_low)
    Ch, Sh = jnp.asarray(C_np * m_high), jnp.asarray(S_np * m_high)

    W_el, b_el = params["emb_low"]                                   # (2F, dh), (dh,)
    W_eh, b_eh = params["emb_high"]
    W_low = Cl @ W_el[:F] + Sl @ W_el[F:]                            # (L, dh)
    W_high = Ch @ W_eh[:F] + Sh @ W_eh[F:]                           # (L, dh)
    W_front = jnp.concatenate([W_low, W_high], axis=1)               # (L, d_model)
    b_front = jnp.concatenate([b_el, b_eh])[None, :]                 # (1, d_model)

    # ---- stack INN weights (leading layer/pair axis), fold 0.1 scales --------
    w1s, b1s, gs, bes, w2s, b2s = [], [], [], [], [], []
    for lp in params["inn"]:
        for (sname, tname), scale in ((("s1", "t1"), lp["scale_1"]),
                                      (("s2", "t2"), lp["scale_2"])):
            W1s_, B1s_, Gs_, Bes_, W2s_, B2s_ = lp[sname]
            W1t_, B1t_, Gt_, Bet_, W2t_, B2t_ = lp[tname]
            w1s.append(jnp.concatenate([W1s_, W1t_], axis=1))        # (dh, 2d)
            b1s.append(jnp.concatenate([B1s_, B1t_])[None, :])       # (1, 2d)
            gs.append(Gs_[None, :]);  bes.append(Bes_[None, :])
            w2s.append(W2s_ * scale); b2s.append((B2s_ * scale)[None, :])
            gs.append(Gt_[None, :]);  bes.append(Bet_[None, :])
            w2s.append(W2t_);         b2s.append(B2t_[None, :])
    w1_all = jnp.stack(w1s)       # (E*2, dh, 2d)
    b1_all = jnp.stack(b1s)       # (E*2, 1, 2d)
    g_all = jnp.stack(gs)         # (E*4, 1, d)
    be_all = jnp.stack(bes)       # (E*4, 1, d)
    w2_all = jnp.stack(w2s)       # (E*4, d, dh)
    b2_all = jnp.stack(b2s)       # (E*4, 1, dh)

    # ---- pre-compose predictors with the irfft basis --------------------------
    icos_np, isin_np = _irfft_basis_np(pf, target_len)
    icos, isin = jnp.asarray(icos_np), jnp.asarray(isin_np)          # (pf, target_len)
    W_pl, b_pl = params["pred_low"]                                  # (dh, 2*pf), (2*pf,)
    W_ph, b_ph = params["pred_high"]
    A_low = W_pl[:, :pf] @ icos + W_pl[:, pf:] @ isin                # (dh, target_len)
    A_high = W_ph[:, :pf] @ icos + W_ph[:, pf:] @ isin
    c_row = ((b_pl[:pf] + b_ph[:pf]) @ icos + (b_pl[pf:] + b_ph[pf:]) @ isin)[None, :]
    pad_c = P_pad - target_len
    A_low = jnp.pad(A_low, ((0, 0), (0, pad_c)))
    A_high = jnp.pad(A_high, ((0, 0), (0, pad_c)))
    c_row = jnp.pad(c_row, ((0, 0), (0, pad_c)))

    # ---- BlockSpecs ------------------------------------------------------------
    c2 = lambda i: (0, 0)
    c3 = lambda i: (0, 0, 0)
    in_specs = [
        pl.BlockSpec((tm, L), lambda i: (i, 0)),                      # x rows (pipelined)
        pl.BlockSpec((L, d_model), c2),                               # W_front
        pl.BlockSpec((1, d_model), c2),                               # b_front
        pl.BlockSpec((e_layers * 2, dh, 2 * d_model), c3),            # w1 (fused s|t)
        pl.BlockSpec((e_layers * 2, 1, 2 * d_model), c3),             # b1
        pl.BlockSpec((e_layers * 4, 1, d_model), c3),                 # gamma
        pl.BlockSpec((e_layers * 4, 1, d_model), c3),                 # beta
        pl.BlockSpec((e_layers * 4, d_model, dh), c3),                # w2
        pl.BlockSpec((e_layers * 4, 1, dh), c3),                      # b2
        pl.BlockSpec((dh, P_pad), c2),                                # A_low
        pl.BlockSpec((dh, P_pad), c2),                                # A_high
        pl.BlockSpec((1, P_pad), c2),                                 # c_row
    ]
    out_spec = pl.BlockSpec((tm, P_pad), lambda i: (i, 0))

    weights = (W_front, b_front, w1_all, b1_all, g_all, be_all, w2_all, b2_all,
               A_low, A_high, c_row)

    # ---- VMEM budget from actual buffer sizes (per-generation cap) ------------
    weight_bytes = sum(int(w.size) * 4 for w in weights)
    io_bytes = (tm * L + tm * P_pad) * 4
    interm_bytes = tm * (6 * d_model + P_pad) * 4
    needed = 2 * (weight_bytes + io_bytes) + interm_bytes + (8 << 20)
    try:
        phys = int(pltpu.get_tpu_info().vmem_capacity_bytes)
    except Exception:
        phys = 64 << 20
    vmem_limit = int(min(max(needed, 16 << 20), int(phys * 0.9)))

    # ---- cost estimate ----------------------------------------------------------
    flops = int(2 * M_pad * L * d_model
                + e_layers * (2 * 2 * M_pad * dh * (2 * d_model)
                              + 4 * 2 * M_pad * d_model * dh)
                + 2 * 2 * M_pad * dh * P_pad)
    transcendentals = int(e_layers * (2 * M_pad * dh + 4 * M_pad))
    bytes_accessed = int(4 * (M_pad * L + M_pad * P_pad) + weight_bytes)

    kernel = functools.partial(_freq_model_kernel, dh=dh, d=d_model,
                               e_layers=e_layers)
    out = pl.pallas_call(
        kernel,
        out_shape=jax.ShapeDtypeStruct((M_pad, P_pad), jnp.float32),
        grid_spec=pltpu.PrefetchScalarGridSpec(
            num_scalar_prefetch=0,
            grid=grid,
            in_specs=in_specs,
            out_specs=out_spec,
        ),
        compiler_params=pltpu.CompilerParams(
            dimension_semantics=("parallel",),
            vmem_limit_bytes=vmem_limit,
        ),
        cost_estimate=pl.CostEstimate(flops=flops,
                                      transcendentals=transcendentals,
                                      bytes_accessed=bytes_accessed),
    )(x2d, *weights)

    pred = out[:M, :target_len].reshape(B, N, target_len)
    return jnp.transpose(pred, (0, 2, 1))                            # (B, target_len, N)


# --------------------------- parameters & reference ---------------------------

def init_params(key, *, seq_len, pred_len, d_model, e_layers):
    F = seq_len // 2 + 1
    pf = pred_len // 2 + 1
    dh = d_model // 2
    keys = iter(jax.random.split(key, 64))

    def lin(kin, kout, scale=0.1):
        return (scale * jax.random.normal(next(keys), (kin, kout), jnp.float32),
                scale * jax.random.normal(next(keys), (kout,), jnp.float32))

    params = {
        "emb_low": lin(2 * F, dh),
        "emb_high": lin(2 * F, dh),
        "pred_low": lin(dh, 2 * pf),
        "pred_high": lin(dh, 2 * pf),
        "inn": [],
    }
    for _ in range(e_layers):
        lp = {"scale_1": jnp.float32(0.1), "scale_2": jnp.float32(0.1)}
        for name in ("s1", "t1", "s2", "t2"):
            W1, B1 = lin(dh, d_model)
            W2, B2 = lin(d_model, dh)
            G = 1.0 + 0.05 * jax.random.normal(next(keys), (d_model,), jnp.float32)
            Be = 0.05 * jax.random.normal(next(keys), (d_model,), jnp.float32)
            lp[name] = (W1, B1, G, Be, W2, B2)
        params["inn"].append(lp)
    return params


def reference_forward(x_enc, params, *, seq_len, pred_len, d_model, e_layers,
                      cutoff_ratio=0.5):
    B, L, N = x_enc.shape
    F = seq_len // 2 + 1
    cutoff = int(F * cutoff_ratio)
    pf = pred_len // 2 + 1
    dh = d_model // 2

    x = jnp.transpose(x_enc, (0, 2, 1))                              # (B, N, L)
    xf = jnp.fft.rfft(x, axis=-1)
    kidx = jnp.arange(F)
    low = jnp.where(kidx[None, None, :] < cutoff, xf, 0.0)
    high = jnp.where(kidx[None, None, :] >= cutoff, xf, 0.0)
    ffl = jnp.concatenate([low.real, low.imag], axis=-1)
    ffh = jnp.concatenate([high.real, high.imag], axis=-1)

    W_el, b_el = params["emb_low"]
    W_eh, b_eh = params["emb_high"]
    x_low = ffl @ W_el + b_el
    x_high = ffh @ W_eh + b_eh
    z = jnp.concatenate([x_low, x_high], axis=-1).reshape(B * N, d_model)

    def net(h, p):
        W1, B1, G, Be, W2, B2 = p
        a = h @ W1 + B1
        mu = a.mean(-1, keepdims=True)
        var = ((a - mu) ** 2).mean(-1, keepdims=True)
        a = (a - mu) / jnp.sqrt(var + 1e-5) * G + Be
        a = jnp.maximum(a, 0.0)
        return a @ W2 + B2

    for lp in params["inn"]:
        x1, x2 = z[:, :dh], z[:, dh:]
        s1 = lp["scale_1"] * net(x2, lp["s1"])
        t1 = net(x2, lp["t1"])
        y1 = x1 * jnp.exp(jnp.clip(s1, -5.0, 5.0)) + t1
        s2 = lp["scale_2"] * net(y1, lp["s2"])
        t2 = net(y1, lp["t2"])
        y2 = x2 * jnp.exp(jnp.clip(s2, -5.0, 5.0)) + t2
        z = jnp.concatenate([y1, y2], axis=-1)

    z = z.reshape(B, N, d_model)
    z_low, z_high = z[..., :dh], z[..., dh:]
    W_pl, b_pl = params["pred_low"]
    W_ph, b_ph = params["pred_high"]
    fp_low = z_low @ W_pl + b_pl
    fp_high = z_high @ W_ph + b_ph
    pred_low = jax.lax.complex(fp_low[..., :pf], fp_low[..., pf:])
    pred_high = jax.lax.complex(fp_high[..., :pf], fp_high[..., pf:])
    xf_pred = pred_low + pred_high
    pred = jnp.fft.irfft(xf_pred, n=(pf - 1) * 2, axis=-1)
    return jnp.transpose(pred, (0, 2, 1))


if __name__ == "__main__":
    B, N = 2, 4
    seq_len, pred_len, d_model, e_layers = 16, 16, 32, 2

    key = jax.random.PRNGKey(0)
    kx, kp = jax.random.split(key)
    x_enc = jax.random.normal(kx, (B, seq_len, N), dtype=jnp.float32)
    params = init_params(kp, seq_len=seq_len, pred_len=pred_len,
                         d_model=d_model, e_layers=e_layers)

    # jit the whole forward so the wrapper transposes / weight pre-composition
    # live in the same XLA program as the Pallas kernel.
    fwd = jax.jit(functools.partial(frequency_model_forward,
                                    seq_len=seq_len, pred_len=pred_len,
                                    d_model=d_model, e_layers=e_layers))
    pred = jax.block_until_ready(fwd(x_enc, params))

    ref = reference_forward(x_enc, params, seq_len=seq_len, pred_len=pred_len,
                            d_model=d_model, e_layers=e_layers)
    target_len = (pred_len // 2 + 1 - 1) * 2
    assert pred.shape == (B, target_len, N), pred.shape
    err = float(jnp.max(jnp.abs(pred - ref)))
    assert jnp.allclose(pred, ref, atol=1e-3, rtol=1e-3), f"max abs err {err}"

    print("KERNEL_OK")
</pallas_src>

<mosaic_0001>
module attributes {stable_mosaic.version = 11 : i64} {
  func.func @_freq_model_kernel(%arg0: i32, %arg1: memref<8x16xf32, #tpu.memory_space<vmem>>, %arg2: memref<16x32xf32, #tpu.memory_space<vmem>>, %arg3: memref<1x32xf32, #tpu.memory_space<vmem>>, %arg4: memref<4x16x64xf32, #tpu.memory_space<vmem>>, %arg5: memref<4x1x64xf32, #tpu.memory_space<vmem>>, %arg6: memref<8x1x32xf32, #tpu.memory_space<vmem>>, %arg7: memref<8x1x32xf32, #tpu.memory_space<vmem>>, %arg8: memref<8x32x16xf32, #tpu.memory_space<vmem>>, %arg9: memref<8x1x16xf32, #tpu.memory_space<vmem>>, %arg10: memref<16x128xf32, #tpu.memory_space<vmem>>, %arg11: memref<16x128xf32, #tpu.memory_space<vmem>>, %arg12: memref<1x128xf32, #tpu.memory_space<vmem>>, %arg13: memref<8x128xf32, #tpu.memory_space<vmem>>) attributes {dimension_semantics = [#tpu.dimension_semantics<parallel>], iteration_bounds = array<i64: 1>, scalar_prefetch = 0 : i64, scratch_operands = 0 : i64, tpu.core_type = #tpu.core_type<tc>, window_params = [{transform_indices = @transform_0, window_bounds = array<i64: 8, 16>}, {pipeline_mode = #tpu.pipeline_mode<synchronous>, transform_indices = @transform_1, window_bounds = array<i64: 16, 32>}, {pipeline_mode = #tpu.pipeline_mode<synchronous>, transform_indices = @transform_2, window_bounds = array<i64: 1, 32>}, {pipeline_mode = #tpu.pipeline_mode<synchronous>, transform_indices = @transform_3, window_bounds = array<i64: 4, 16, 64>}, {pipeline_mode = #tpu.pipeline_mode<synchronous>, transform_indices = @transform_4, window_bounds = array<i64: 4, 1, 64>}, {pipeline_mode = #tpu.pipeline_mode<synchronous>, transform_indices = @transform_5, window_bounds = array<i64: 8, 1, 32>}, {pipeline_mode = #tpu.pipeline_mode<synchronous>, transform_indices = @transform_6, window_bounds = array<i64: 8, 1, 32>}, {pipeline_mode = #tpu.pipeline_mode<synchronous>, transform_indices = @transform_7, window_bounds = array<i64: 8, 32, 16>}, {pipeline_mode = #tpu.pipeline_mode<synchronous>, transform_indices = @transform_8, window_bounds = array<i64: 8, 1, 16>}, {pipeline_mode = #tpu.pipeline_mode<synchronous>, transform_indices = @transform_9, window_bounds = array<i64: 16, 128>}, {pipeline_mode = #tpu.pipeline_mode<synchronous>, transform_indices = @transform_10, window_bounds = array<i64: 16, 128>}, {pipeline_mode = #tpu.pipeline_mode<synchronous>, transform_indices = @transform_11, window_bounds = array<i64: 1, 128>}, {transform_indices = @transform_12, window_bounds = array<i64: 8, 128>}]} {
    %c0 = arith.constant 0 : index
    %c0_0 = arith.constant 0 : index
    %0 = vector.load %arg1[%c0, %c0_0] : memref<8x16xf32, #tpu.memory_space<vmem>>, vector<8x16xf32>
    %c0_1 = arith.constant 0 : index
    %c0_2 = arith.constant 0 : index
    %1 = vector.load %arg2[%c0_1, %c0_2] : memref<16x32xf32, #tpu.memory_space<vmem>>, vector<16x32xf32>
    %cst = arith.constant dense<0.000000e+00> : vector<8x32xf32>
    %2 = tpu.matmul %0, %1, %cst {dimension_numbers = #tpu.dot_dimension_numbers<[1], [0], [0], [1], [0, 0, 1, 1], [], []>} : vector<8x16xf32>, vector<16x32xf32>, vector<8x32xf32> -> vector<8x32xf32>
    %c0_3 = arith.constant 0 : index
    %c0_4 = arith.constant 0 : index
    %3 = vector.load %arg3[%c0_3, %c0_4] : memref<1x32xf32, #tpu.memory_space<vmem>>, vector<1x32xf32>
    %4 = vector.broadcast %3 : vector<1x32xf32> to vector<8x32xf32>
    %5 = arith.addf %2, %4 : vector<8x32xf32>
    %6 = vector.extract_strided_slice %5 {offsets = [0, 0], sizes = [8, 16], strides = [1, 1]} : vector<8x32xf32> to vector<8x16xf32>
    %7 = vector.extract_strided_slice %5 {offsets = [0, 16], sizes = [8, 16], strides = [1, 1]} : vector<8x32xf32> to vector<8x16xf32>
    %c0_5 = arith.constant 0 : index
    %c0_6 = arith.constant 0 : index
    %c0_7 = arith.constant 0 : index
    %8 = vector.load %arg4[%c0_5, %c0_6, %c0_7] : memref<4x16x64xf32, #tpu.memory_space<vmem>>, vector<1x16x64xf32>
    %9 = vector.shape_cast %8 : vector<1x16x64xf32> to vector<16x64xf32>
    %cst_8 = arith.constant dense<0.000000e+00> : vector<8x64xf32>
    %10 = tpu.matmul %7, %9, %cst_8 {dimension_numbers = #tpu.dot_dimension_numbers<[1], [0], [0], [1], [0, 0, 1, 1], [], []>} : vector<8x16xf32>, vector<16x64xf32>, vector<8x64xf32> -> vector<8x64xf32>
    %c0_9 = arith.constant 0 : index
    %c0_10 = arith.constant 0 : index
    %c0_11 = arith.constant 0 : index
    %11 = vector.load %arg5[%c0_9, %c0_10, %c0_11] : memref<4x1x64xf32, #tpu.memory_space<vmem>>, vector<1x1x64xf32>
    %12 = vector.shape_cast %11 : vector<1x1x64xf32> to vector<1x64xf32>
    %13 = vector.broadcast %12 : vector<1x64xf32> to vector<8x64xf32>
    %14 = arith.addf %10, %13 : vector<8x64xf32>
    %15 = vector.extract_strided_slice %14 {offsets = [0, 0], sizes = [8, 32], strides = [1, 1]} : vector<8x64xf32> to vector<8x32xf32>
    %cst_12 = arith.constant dense<0.000000e+00> : vector<8xf32>
    %16 = vector.multi_reduction <add>, %15, %cst_12 [1] : vector<8x32xf32> to vector<8xf32>
    %17 = vector.shape_cast %16 : vector<8xf32> to vector<8x1xf32>
    %cst_13 = arith.constant 3.200000e+01 : f32
    %18 = vector.broadcast %cst_13 : f32 to vector<8x1xf32>
    %19 = arith.divf %17, %18 : vector<8x1xf32>
    %20 = arith.mulf %15, %15 : vector<8x32xf32>
    %cst_14 = arith.constant dense<0.000000e+00> : vector<8xf32>
    %21 = vector.multi_reduction <add>, %20, %cst_14 [1] : vector<8x32xf32> to vector<8xf32>
    %22 = vector.shape_cast %21 : vector<8xf32> to vector<8x1xf32>
    %cst_15 = arith.constant 3.200000e+01 : f32
    %23 = vector.broadcast %cst_15 : f32 to vector<8x1xf32>
    %24 = arith.divf %22, %23 : vector<8x1xf32>
    %25 = arith.mulf %19, %19 : vector<8x1xf32>
    %26 = arith.subf %24, %25 : vector<8x1xf32>
    %27 = vector.broadcast %19 : vector<8x1xf32> to vector<8x32xf32>
    %28 = arith.subf %15, %27 : vector<8x32xf32>
    %cst_16 = arith.constant 9.99999974E-6 : f32
    %29 = vector.broadcast %cst_16 : f32 to vector<8x1xf32>
    %30 = arith.addf %26, %29 : vector<8x1xf32>
    %31 = math.rsqrt %30 : vector<8x1xf32>
    %32 = vector.broadcast %31 : vector<8x1xf32> to vector<8x32xf32>
    %33 = arith.mulf %28, %32 : vector<8x32xf32>
    %c0_17 = arith.constant 0 : index
    %c0_18 = arith.constant 0 : index
    %c0_19 = arith.constant 0 : index
    %34 = vector.load %arg6[%c0_17, %c0_18, %c0_19] : memref<8x1x32xf32, #tpu.memory_space<vmem>>, vector<1x1x32xf32>
    %35 = vector.shape_cast %34 : vector<1x1x32xf32> to vector<1x32xf32>
    %36 = vector.broadcast %35 : vector<1x32xf32> to vector<8x32xf32>
    %37 = arith.mulf %33, %36 : vector<8x32xf32>
    %c0_20 = arith.constant 0 : index
    %c0_21 = arith.constant 0 : index
    %c0_22 = arith.constant 0 : index
    %38 = vector.load %arg7[%c0_20, %c0_21, %c0_22] : memref<8x1x32xf32, #tpu.memory_space<vmem>>, vector<1x1x32xf32>
    %39 = vector.shape_cast %38 : vector<1x1x32xf32> to vector<1x32xf32>
    %40 = vector.broadcast %39 : vector<1x32xf32> to vector<8x32xf32>
    %41 = arith.addf %37, %40 : vector<8x32xf32>
    %cst_23 = arith.constant 0.000000e+00 : f32
    %42 = vector.broadcast %cst_23 : f32 to vector<8x32xf32>
    %43 = arith.maximumf %41, %42 : vector<8x32xf32>
    %c0_24 = arith.constant 0 : index
    %c0_25 = arith.constant 0 : index
    %c0_26 = arith.constant 0 : index
    %44 = vector.load %arg8[%c0_24, %c0_25, %c0_26] : memref<8x32x16xf32, #tpu.memory_space<vmem>>, vector<1x32x16xf32>
    %45 = vector.shape_cast %44 : vector<1x32x16xf32> to vector<32x16xf32>
    %cst_27 = arith.constant dense<0.000000e+00> : vector<8x16xf32>
    %46 = tpu.matmul %43, %45, %cst_27 {dimension_numbers = #tpu.dot_dimension_numbers<[1], [0], [0], [1], [0, 0, 1, 1], [], []>} : vector<8x32xf32>, vector<32x16xf32>, vector<8x16xf32> -> vector<8x16xf32>
    %c0_28 = arith.constant 0 : index
    %c0_29 = arith.constant 0 : index
    %c0_30 = arith.constant 0 : index
    %47 = vector.load %arg9[%c0_28, %c0_29, %c0_30] : memref<8x1x16xf32, #tpu.memory_space<vmem>>, vector<1x1x16xf32>
    %48 = vector.shape_cast %47 : vector<1x1x16xf32> to vector<1x16xf32>
    %49 = vector.broadcast %48 : vector<1x16xf32> to vector<8x16xf32>
    %50 = arith.addf %46, %49 : vector<8x16xf32>
    %51 = vector.extract_strided_slice %14 {offsets = [0, 32], sizes = [8, 32], strides = [1, 1]} : vector<8x64xf32> to vector<8x32xf32>
    %cst_31 = arith.constant dense<0.000000e+00> : vector<8xf32>
    %52 = vector.multi_reduction <add>, %51, %cst_31 [1] : vector<8x32xf32> to vector<8xf32>
    %53 = vector.shape_cast %52 : vector<8xf32> to vector<8x1xf32>
    %cst_32 = arith.constant 3.200000e+01 : f32
    %54 = vector.broadcast %cst_32 : f32 to vector<8x1xf32>
    %55 = arith.divf %53, %54 : vector<8x1xf32>
    %56 = arith.mulf %51, %51 : vector<8x32xf32>
    %cst_33 = arith.constant dense<0.000000e+00> : vector<8xf32>
    %57 = vector.multi_reduction <add>, %56, %cst_33 [1] : vector<8x32xf32> to vector<8xf32>
    %58 = vector.shape_cast %57 : vector<8xf32> to vector<8x1xf32>
    %cst_34 = arith.constant 3.200000e+01 : f32
    %59 = vector.broadcast %cst_34 : f32 to vector<8x1xf32>
    %60 = arith.divf %58, %59 : vector<8x1xf32>
    %61 = arith.mulf %55, %55 : vector<8x1xf32>
    %62 = arith.subf %60, %61 : vector<8x1xf32>
    %63 = vector.broadcast %55 : vector<8x1xf32> to vector<8x32xf32>
    %64 = arith.subf %51, %63 : vector<8x32xf32>
    %cst_35 = arith.constant 9.99999974E-6 : f32
    %65 = vector.broadcast %cst_35 : f32 to vector<8x1xf32>
    %66 = arith.addf %62, %65 : vector<8x1xf32>
    %67 = math.rsqrt %66 : vector<8x1xf32>
    %68 = vector.broadcast %67 : vector<8x1xf32> to vector<8x32xf32>
    %69 = arith.mulf %64, %68 : vector<8x32xf32>
    %c1 = arith.constant 1 : index
    %c0_36 = arith.constant 0 : index
    %c0_37 = arith.constant 0 : index
    %70 = vector.load %arg6[%c1, %c0_36, %c0_37] : memref<8x1x32xf32, #tpu.memory_space<vmem>>, vector<1x1x32xf32>
    %71 = vector.shape_cast %70 : vector<1x1x32xf32> to vector<1x32xf32>
    %72 = vector.broadcast %71 : vector<1x32xf32> to vector<8x32xf32>
    %73 = arith.mulf %69, %72 : vector<8x32xf32>
    %c1_38 = arith.constant 1 : index
    %c0_39 = arith.constant 0 : index
    %c0_40 = arith.constant 0 : index
    %74 = vector.load %arg7[%c1_38, %c0_39, %c0_40] : memref<8x1x32xf32, #tpu.memory_space<vmem>>, vector<1x1x32xf32>
    %75 = vector.shape_cast %74 : vector<1x1x32xf32> to vector<1x32xf32>
    %76 = vector.broadcast %75 : vector<1x32xf32> to vector<8x32xf32>
    %77 = arith.addf %73, %76 : vector<8x32xf32>
    %cst_41 = arith.constant 0.000000e+00 : f32
    %78 = vector.broadcast %cst_41 : f32 to vector<8x32xf32>
    %79 = arith.maximumf %77, %78 : vector<8x32xf32>
    %c1_42 = arith.constant 1 : index
    %c0_43 = arith.constant 0 : index
    %c0_44 = arith.constant 0 : index
    %80 = vector.load %arg8[%c1_42, %c0_43, %c0_44] : memref<8x32x16xf32, #tpu.memory_space<vmem>>, vector<1x32x16xf32>
    %81 = vector.shape_cast %80 : vector<1x32x16xf32> to vector<32x16xf32>
    %cst_45 = arith.constant dense<0.000000e+00> : vector<8x16xf32>
    %82 = tpu.matmul %79, %81, %cst_45 {dimension_numbers = #tpu.dot_dimension_numbers<[1], [0], [0], [1], [0, 0, 1, 1], [], []>} : vector<8x32xf32>, vector<32x16xf32>, vector<8x16xf32> -> vector<8x16xf32>
    %c1_46 = arith.constant 1 : index
    %c0_47 = arith.constant 0 : index
    %c0_48 = arith.constant 0 : index
    %83 = vector.load %arg9[%c1_46, %c0_47, %c0_48] : memref<8x1x16xf32, #tpu.memory_space<vmem>>, vector<1x1x16xf32>
    %84 = vector.shape_cast %83 : vector<1x1x16xf32> to vector<1x16xf32>
    %85 = vector.broadcast %84 : vector<1x16xf32> to vector<8x16xf32>
    %86 = arith.addf %82, %85 : vector<8x16xf32>
    %cst_49 = arith.constant -5.000000e+00 : f32
    %cst_50 = arith.constant 5.000000e+00 : f32
    %87 = vector.broadcast %cst_49 : f32 to vector<8x16xf32>
    %88 = arith.maximumf %87, %50 : vector<8x16xf32>
    %89 = vector.broadcast %cst_50 : f32 to vector<8x16xf32>
    %90 = arith.minimumf %89, %88 : vector<8x16xf32>
    %91 = math.exp %90 : vector<8x16xf32>
    %92 = arith.mulf %6, %91 : vector<8x16xf32>
    %93 = arith.addf %92, %86 : vector<8x16xf32>
    %c1_51 = arith.constant 1 : index
    %c0_52 = arith.constant 0 : index
    %c0_53 = arith.constant 0 : index
    %94 = vector.load %arg4[%c1_51, %c0_52, %c0_53] : memref<4x16x64xf32, #tpu.memory_space<vmem>>, vector<1x16x64xf32>
    %95 = vector.shape_cast %94 : vector<1x16x64xf32> to vector<16x64xf32>
    %cst_54 = arith.constant dense<0.000000e+00> : vector<8x64xf32>
    %96 = tpu.matmul %93, %95, %cst_54 {dimension_numbers = #tpu.dot_dimension_numbers<[1], [0], [0], [1], [0, 0, 1, 1], [], []>} : vector<8x16xf32>, vector<16x64xf32>, vector<8x64xf32> -> vector<8x64xf32>
    %c1_55 = arith.constant 1 : index
    %c0_56 = arith.constant 0 : index
    %c0_57 = arith.constant 0 : index
    %97 = vector.load %arg5[%c1_55, %c0_56, %c0_57] : memref<4x1x64xf32, #tpu.memory_space<vmem>>, vector<1x1x64xf32>
    %98 = vector.shape_cast %97 : vector<1x1x64xf32> to vector<1x64xf32>
    %99 = vector.broadcast %98 : vector<1x64xf32> to vector<8x64xf32>
    %100 = arith.addf %96, %99 : vector<8x64xf32>
    %101 = vector.extract_strided_slice %100 {offsets = [0, 0], sizes = [8, 32], strides = [1, 1]} : vector<8x64xf32> to vector<8x32xf32>
    %cst_58 = arith.constant dense<0.000000e+00> : vector<8xf32>
    %102 = vector.multi_reduction <add>, %101, %cst_58 [1] : vector<8x32xf32> to vector<8xf32>
    %103 = vector.shape_cast %102 : vector<8xf32> to vector<8x1xf32>
    %cst_59 = arith.constant 3.200000e+01 : f32
    %104 = vector.broadcast %cst_59 : f32 to vector<8x1xf32>
    %105 = arith.divf %103, %104 : vector<8x1xf32>
    %106 = arith.mulf %101, %101 : vector<8x32xf32>
    %cst_60 = arith.constant dense<0.000000e+00> : vector<8xf32>
    %107 = vector.multi_reduction <add>, %106, %cst_60 [1] : vector<8x32xf32> to vector<8xf32>
    %108 = vector.shape_cast %107 : vector<8xf32> to vector<8x1xf32>
    %cst_61 = arith.constant 3.200000e+01 : f32
    %109 = vector.broadcast %cst_61 : f32 to vector<8x1xf32>
    %110 = arith.divf %108, %109 : vector<8x1xf32>
    %111 = arith.mulf %105, %105 : vector<8x1xf32>
    %112 = arith.subf %110, %111 : vector<8x1xf32>
    %113 = vector.broadcast %105 : vector<8x1xf32> to vector<8x32xf32>
    %114 = arith.subf %101, %113 : vector<8x32xf32>
    %cst_62 = arith.constant 9.99999974E-6 : f32
    %115 = vector.broadcast %cst_62 : f32 to vector<8x1xf32>
    %116 = arith.addf %112, %115 : vector<8x1xf32>
    %117 = math.rsqrt %116 : vector<8x1xf32>
    %118 = vector.broadcast %117 : vector<8x1xf32> to vector<8x32xf32>
    %119 = arith.mulf %114, %118 : vector<8x32xf32>
    %c2 = arith.constant 2 : index
    %c0_63 = arith.constant 0 : index
    %c0_64 = arith.constant 0 : index
    %120 = vector.load %arg6[%c2, %c0_63, %c0_64] : memref<8x1x32xf32, #tpu.memory_space<vmem>>, vector<1x1x32xf32>
    %121 = vector.shape_cast %120 : vector<1x1x32xf32> to vector<1x32xf32>
    %122 = vector.broadcast %121 : vector<1x32xf32> to vector<8x32xf32>
    %123 = arith.mulf %119, %122 : vector<8x32xf32>
    %c2_65 = arith.constant 2 : index
    %c0_66 = arith.constant 0 : index
    %c0_67 = arith.constant 0 : index
    %124 = vector.load %arg7[%c2_65, %c0_66, %c0_67] : memref<8x1x32xf32, #tpu.memory_space<vmem>>, vector<1x1x32xf32>
    %125 = vector.shape_cast %124 : vector<1x1x32xf32> to vector<1x32xf32>
    %126 = vector.broadcast %125 : vector<1x32xf32> to vector<8x32xf32>
    %127 = arith.addf %123, %126 : vector<8x32xf32>
    %cst_68 = arith.constant 0.000000e+00 : f32
    %128 = vector.broadcast %cst_68 : f32 to vector<8x32xf32>
    %129 = arith.maximumf %127, %128 : vector<8x32xf32>
    %c2_69 = arith.constant 2 : index
    %c0_70 = arith.constant 0 : index
    %c0_71 = arith.constant 0 : index
    %130 = vector.load %arg8[%c2_69, %c0_70, %c0_71] : memref<8x32x16xf32, #tpu.memory_space<vmem>>, vector<1x32x16xf32>
    %131 = vector.shape_cast %130 : vector<1x32x16xf32> to vector<32x16xf32>
    %cst_72 = arith.constant dense<0.000000e+00> : vector<8x16xf32>
    %132 = tpu.matmul %129, %131, %cst_72 {dimension_numbers = #tpu.dot_dimension_numbers<[1], [0], [0], [1], [0, 0, 1, 1], [], []>} : vector<8x32xf32>, vector<32x16xf32>, vector<8x16xf32> -> vector<8x16xf32>
    %c2_73 = arith.constant 2 : index
    %c0_74 = arith.constant 0 : index
    %c0_75 = arith.constant 0 : index
    %133 = vector.load %arg9[%c2_73, %c0_74, %c0_75] : memref<8x1x16xf32, #tpu.memory_space<vmem>>, vector<1x1x16xf32>
    %134 = vector.shape_cast %133 : vector<1x1x16xf32> to vector<1x16xf32>
    %135 = vector.broadcast %134 : vector<1x16xf32> to vector<8x16xf32>
    %136 = arith.addf %132, %135 : vector<8x16xf32>
    %137 = vector.extract_strided_slice %100 {offsets = [0, 32], sizes = [8, 32], strides = [1, 1]} : vector<8x64xf32> to vector<8x32xf32>
    %cst_76 = arith.constant dense<0.000000e+00> : vector<8xf32>
    %138 = vector.multi_reduction <add>, %137, %cst_76 [1] : vector<8x32xf32> to vector<8xf32>
    %139 = vector.shape_cast %138 : vector<8xf32> to vector<8x1xf32>
    %cst_77 = arith.constant 3.200000e+01 : f32
    %140 = vector.broadcast %cst_77 : f32 to vector<8x1xf32>
    %141 = arith.divf %139, %140 : vector<8x1xf32>
    %142 = arith.mulf %137, %137 : vector<8x32xf32>
    %cst_78 = arith.constant dense<0.000000e+00> : vector<8xf32>
    %143 = vector.multi_reduction <add>, %142, %cst_78 [1] : vector<8x32xf32> to vector<8xf32>
    %144 = vector.shape_cast %143 : vector<8xf32> to vector<8x1xf32>
    %cst_79 = arith.constant 3.200000e+01 : f32
    %145 = vector.broadcast %cst_79 : f32 to vector<8x1xf32>
    %146 = arith.divf %144, %145 : vector<8x1xf32>
    %147 = arith.mulf %141, %141 : vector<8x1xf32>
    %148 = arith.subf %146, %147 : vector<8x1xf32>
    %149 = vector.broadcast %141 : vector<8x1xf32> to vector<8x32xf32>
    %150 = arith.subf %137, %149 : vector<8x32xf32>
    %cst_80 = arith.constant 9.99999974E-6 : f32
    %151 = vector.broadcast %cst_80 : f32 to vector<8x1xf32>
    %152 = arith.addf %148, %151 : vector<8x1xf32>
    %153 = math.rsqrt %152 : vector<8x1xf32>
    %154 = vector.broadcast %153 : vector<8x1xf32> to vector<8x32xf32>
    %155 = arith.mulf %150, %154 : vector<8x32xf32>
    %c3 = arith.constant 3 : index
    %c0_81 = arith.constant 0 : index
    %c0_82 = arith.constant 0 : index
    %156 = vector.load %arg6[%c3, %c0_81, %c0_82] : memref<8x1x32xf32, #tpu.memory_space<vmem>>, vector<1x1x32xf32>
    %157 = vector.shape_cast %156 : vector<1x1x32xf32> to vector<1x32xf32>
    %158 = vector.broadcast %157 : vector<1x32xf32> to vector<8x32xf32>
    %159 = arith.mulf %155, %158 : vector<8x32xf32>
    %c3_83 = arith.constant 3 : index
    %c0_84 = arith.constant 0 : index
    %c0_85 = arith.constant 0 : index
    %160 = vector.load %arg7[%c3_83, %c0_84, %c0_85] : memref<8x1x32xf32, #tpu.memory_space<vmem>>, vector<1x1x32xf32>
    %161 = vector.shape_cast %160 : vector<1x1x32xf32> to vector<1x32xf32>
    %162 = vector.broadcast %161 : vector<1x32xf32> to vector<8x32xf32>
    %163 = arith.addf %159, %162 : vector<8x32xf32>
    %cst_86 = arith.constant 0.000000e+00 : f32
    %164 = vector.broadcast %cst_86 : f32 to vector<8x32xf32>
    %165 = arith.maximumf %163, %164 : vector<8x32xf32>
    %c3_87 = arith.constant 3 : index
    %c0_88 = arith.constant 0 : index
    %c0_89 = arith.constant 0 : index
    %166 = vector.load %arg8[%c3_87, %c0_88, %c0_89] : memref<8x32x16xf32, #tpu.memory_space<vmem>>, vector<1x32x16xf32>
    %167 = vector.shape_cast %166 : vector<1x32x16xf32> to vector<32x16xf32>
    %cst_90 = arith.constant dense<0.000000e+00> : vector<8x16xf32>
    %168 = tpu.matmul %165, %167, %cst_90 {dimension_numbers = #tpu.dot_dimension_numbers<[1], [0], [0], [1], [0, 0, 1, 1], [], []>} : vector<8x32xf32>, vector<32x16xf32>, vector<8x16xf32> -> vector<8x16xf32>
    %c3_91 = arith.constant 3 : index
    %c0_92 = arith.constant 0 : index
    %c0_93 = arith.constant 0 : index
    %169 = vector.load %arg9[%c3_91, %c0_92, %c0_93] : memref<8x1x16xf32, #tpu.memory_space<vmem>>, vector<1x1x16xf32>
    %170 = vector.shape_cast %169 : vector<1x1x16xf32> to vector<1x16xf32>
    %171 = vector.broadcast %170 : vector<1x16xf32> to vector<8x16xf32>
    %172 = arith.addf %168, %171 : vector<8x16xf32>
    %cst_94 = arith.constant -5.000000e+00 : f32
    %cst_95 = arith.constant 5.000000e+00 : f32
    %173 = vector.broadcast %cst_94 : f32 to vector<8x16xf32>
    %174 = arith.maximumf %173, %136 : vector<8x16xf32>
    %175 = vector.broadcast %cst_95 : f32 to vector<8x16xf32>
    %176 = arith.minimumf %175, %174 : vector<8x16xf32>
    %177 = math.exp %176 : vector<8x16xf32>
    %178 = arith.mulf %7, %177 : vector<8x16xf32>
    %179 = arith.addf %178, %172 : vector<8x16xf32>
    %c2_96 = arith.constant 2 : index
    %c0_97 = arith.constant 0 : index
    %c0_98 = arith.constant 0 : index
    %180 = vector.load %arg4[%c2_96, %c0_97, %c0_98] : memref<4x16x64xf32, #tpu.memory_space<vmem>>, vector<1x16x64xf32>
    %181 = vector.shape_cast %180 : vector<1x16x64xf32> to vector<16x64xf32>
    %cst_99 = arith.constant dense<0.000000e+00> : vector<8x64xf32>
    %182 = tpu.matmul %179, %181, %cst_99 {dimension_numbers = #tpu.dot_dimension_numbers<[1], [0], [0], [1], [0, 0, 1, 1], [], []>} : vector<8x16xf32>, vector<16x64xf32>, vector<8x64xf32> -> vector<8x64xf32>
    %c2_100 = arith.constant 2 : index
    %c0_101 = arith.constant 0 : index
    %c0_102 = arith.constant 0 : index
    %183 = vector.load %arg5[%c2_100, %c0_101, %c0_102] : memref<4x1x64xf32, #tpu.memory_space<vmem>>, vector<1x1x64xf32>
    %184 = vector.shape_cast %183 : vector<1x1x64xf32> to vector<1x64xf32>
    %185 = vector.broadcast %184 : vector<1x64xf32> to vector<8x64xf32>
    %186 = arith.addf %182, %185 : vector<8x64xf32>
    %187 = vector.extract_strided_slice %186 {offsets = [0, 0], sizes = [8, 32], strides = [1, 1]} : vector<8x64xf32> to vector<8x32xf32>
    %cst_103 = arith.constant dense<0.000000e+00> : vector<8xf32>
    %188 = vector.multi_reduction <add>, %187, %cst_103 [1] : vector<8x32xf32> to vector<8xf32>
    %189 = vector.shape_cast %188 : vector<8xf32> to vector<8x1xf32>
    %cst_104 = arith.constant 3.200000e+01 : f32
    %190 = vector.broadcast %cst_104 : f32 to vector<8x1xf32>
    %191 = arith.divf %189, %190 : vector<8x1xf32>
    %192 = arith.mulf %187, %187 : vector<8x32xf32>
    %cst_105 = arith.constant dense<0.000000e+00> : vector<8xf32>
    %193 = vector.multi_reduction <add>, %192, %cst_105 [1] : vector<8x32xf32> to vector<8xf32>
    %194 = vector.shape_cast %193 : vector<8xf32> to vector<8x1xf32>
    %cst_106 = arith.constant 3.200000e+01 : f32
    %195 = vector.broadcast %cst_106 : f32 to vector<8x1xf32>
    %196 = arith.divf %194, %195 : vector<8x1xf32>
    %197 = arith.mulf %191, %191 : vector<8x1xf32>
    %198 = arith.subf %196, %197 : vector<8x1xf32>
    %199 = vector.broadcast %191 : vector<8x1xf32> to vector<8x32xf32>
    %200 = arith.subf %187, %199 : vector<8x32xf32>
    %cst_107 = arith.constant 9.99999974E-6 : f32
    %201 = vector.broadcast %cst_107 : f32 to vector<8x1xf32>
    %202 = arith.addf %198, %201 : vector<8x1xf32>
    %203 = math.rsqrt %202 : vector<8x1xf32>
    %204 = vector.broadcast %203 : vector<8x1xf32> to vector<8x32xf32>
    %205 = arith.mulf %200, %204 : vector<8x32xf32>
    %c4 = arith.constant 4 : index
    %c0_108 = arith.constant 0 : index
    %c0_109 = arith.constant 0 : index
    %206 = vector.load %arg6[%c4, %c0_108, %c0_109] : memref<8x1x32xf32, #tpu.memory_space<vmem>>, vector<1x1x32xf32>
    %207 = vector.shape_cast %206 : vector<1x1x32xf32> to vector<1x32xf32>
    %208 = vector.broadcast %207 : vector<1x32xf32> to vector<8x32xf32>
    %209 = arith.mulf %205, %208 : vector<8x32xf32>
    %c4_110 = arith.constant 4 : index
    %c0_111 = arith.constant 0 : index
    %c0_112 = arith.constant 0 : index
    %210 = vector.load %arg7[%c4_110, %c0_111, %c0_112] : memref<8x1x32xf32, #tpu.memory_space<vmem>>, vector<1x1x32xf32>
    %211 = vector.shape_cast %210 : vector<1x1x32xf32> to vector<1x32xf32>
    %212 = vector.broadcast %211 : vector<1x32xf32> to vector<8x32xf32>
    %213 = arith.addf %209, %212 : vector<8x32xf32>
    %cst_113 = arith.constant 0.000000e+00 : f32
    %214 = vector.broadcast %cst_113 : f32 to vector<8x32xf32>
    %215 = arith.maximumf %213, %214 : vector<8x32xf32>
    %c4_114 = arith.constant 4 : index
    %c0_115 = arith.constant 0 : index
    %c0_116 = arith.constant 0 : index
    %216 = vector.load %arg8[%c4_114, %c0_115, %c0_116] : memref<8x32x16xf32, #tpu.memory_space<vmem>>, vector<1x32x16xf32>
    %217 = vector.shape_cast %216 : vector<1x32x16xf32> to vector<32x16xf32>
    %cst_117 = arith.constant dense<0.000000e+00> : vector<8x16xf32>
    %218 = tpu.matmul %215, %217, %cst_117 {dimension_numbers = #tpu.dot_dimension_numbers<[1], [0], [0], [1], [0, 0, 1, 1], [], []>} : vector<8x32xf32>, vector<32x16xf32>, vector<8x16xf32> -> vector<8x16xf32>
    %c4_118 = arith.constant 4 : index
    %c0_119 = arith.constant 0 : index
    %c0_120 = arith.constant 0 : index
    %219 = vector.load %arg9[%c4_118, %c0_119, %c0_120] : memref<8x1x16xf32, #tpu.memory_space<vmem>>, vector<1x1x16xf32>
    %220 = vector.shape_cast %219 : vector<1x1x16xf32> to vector<1x16xf32>
    %221 = vector.broadcast %220 : vector<1x16xf32> to vector<8x16xf32>
    %222 = arith.addf %218, %221 : vector<8x16xf32>
    %223 = vector.extract_strided_slice %186 {offsets = [0, 32], sizes = [8, 32], strides = [1, 1]} : vector<8x64xf32> to vector<8x32xf32>
    %cst_121 = arith.constant dense<0.000000e+00> : vector<8xf32>
    %224 = vector.multi_reduction <add>, %223, %cst_121 [1] : vector<8x32xf32> to vector<8xf32>
    %225 = vector.shape_cast %224 : vector<8xf32> to vector<8x1xf32>
    %cst_122 = arith.constant 3.200000e+01 : f32
    %226 = vector.broadcast %cst_122 : f32 to vector<8x1xf32>
    %227 = arith.divf %225, %226 : vector<8x1xf32>
    %228 = arith.mulf %223, %223 : vector<8x32xf32>
    %cst_123 = arith.constant dense<0.000000e+00> : vector<8xf32>
    %229 = vector.multi_reduction <add>, %228, %cst_123 [1] : vector<8x32xf32> to vector<8xf32>
    %230 = vector.shape_cast %229 : vector<8xf32> to vector<8x1xf32>
    %cst_124 = arith.constant 3.200000e+01 : f32
    %231 = vector.broadcast %cst_124 : f32 to vector<8x1xf32>
    %232 = arith.divf %230, %231 : vector<8x1xf32>
    %233 = arith.mulf %227, %227 : vector<8x1xf32>
    %234 = arith.subf %232, %233 : vector<8x1xf32>
    %235 = vector.broadcast %227 : vector<8x1xf32> to vector<8x32xf32>
    %236 = arith.subf %223, %235 : vector<8x32xf32>
    %cst_125 = arith.constant 9.99999974E-6 : f32
    %237 = vector.broadcast %cst_125 : f32 to vector<8x1xf32>
    %238 = arith.addf %234, %237 : vector<8x1xf32>
    %239 = math.rsqrt %238 : vector<8x1xf32>
    %240 = vector.broadcast %239 : vector<8x1xf32> to vector<8x32xf32>
    %241 = arith.mulf %236, %240 : vector<8x32xf32>
    %c5 = arith.constant 5 : index
    %c0_126 = arith.constant 0 : index
    %c0_127 = arith.constant 0 : index
    %242 = vector.load %arg6[%c5, %c0_126, %c0_127] : memref<8x1x32xf32, #tpu.memory_space<vmem>>, vector<1x1x32xf32>
    %243 = vector.shape_cast %242 : vector<1x1x32xf32> to vector<1x32xf32>
    %244 = vector.broadcast %243 : vector<1x32xf32> to vector<8x32xf32>
    %245 = arith.mulf %241, %244 : vector<8x32xf32>
    %c5_128 = arith.constant 5 : index
    %c0_129 = arith.constant 0 : index
    %c0_130 = arith.constant 0 : index
    %246 = vector.load %arg7[%c5_128, %c0_129, %c0_130] : memref<8x1x32xf32, #tpu.memory_space<vmem>>, vector<1x1x32xf32>
    %247 = vector.shape_cast %246 : vector<1x1x32xf32> to vector<1x32xf32>
    %248 = vector.broadcast %247 : vector<1x32xf32> to vector<8x32xf32>
    %249 = arith.addf %245, %248 : vector<8x32xf32>
    %cst_131 = arith.constant 0.000000e+00 : f32
    %250 = vector.broadcast %cst_131 : f32 to vector<8x32xf32>
    %251 = arith.maximumf %249, %250 : vector<8x32xf32>
    %c5_132 = arith.constant 5 : index
    %c0_133 = arith.constant 0 : index
    %c0_134 = arith.constant 0 : index
    %252 = vector.load %arg8[%c5_132, %c0_133, %c0_134] : memref<8x32x16xf32, #tpu.memory_space<vmem>>, vector<1x32x16xf32>
    %253 = vector.shape_cast %252 : vector<1x32x16xf32> to vector<32x16xf32>
    %cst_135 = arith.constant dense<0.000000e+00> : vector<8x16xf32>
    %254 = tpu.matmul %251, %253, %cst_135 {dimension_numbers = #tpu.dot_dimension_numbers<[1], [0], [0], [1], [0, 0, 1, 1], [], []>} : vector<8x32xf32>, vector<32x16xf32>, vector<8x16xf32> -> vector<8x16xf32>
    %c5_136 = arith.constant 5 : index
    %c0_137 = arith.constant 0 : index
    %c0_138 = arith.constant 0 : index
    %255 = vector.load %arg9[%c5_136, %c0_137, %c0_138] : memref<8x1x16xf32, #tpu.memory_space<vmem>>, vector<1x1x16xf32>
    %256 = vector.shape_cast %255 : vector<1x1x16xf32> to vector<1x16xf32>
    %257 = vector.broadcast %256 : vector<1x16xf32> to vector<8x16xf32>
    %258 = arith.addf %254, %257 : vector<8x16xf32>
    %cst_139 = arith.constant -5.000000e+00 : f32
    %cst_140 = arith.constant 5.000000e+00 : f32
    %259 = vector.broadcast %cst_139 : f32 to vector<8x16xf32>
    %260 = arith.maximumf %259, %222 : vector<8x16xf32>
    %261 = vector.broadcast %cst_140 : f32 to vector<8x16xf32>
    %262 = arith.minimumf %261, %260 : vector<8x16xf32>
    %263 = math.exp %262 : vector<8x16xf32>
    %264 = arith.mulf %93, %263 : vector<8x16xf32>
    %265 = arith.addf %264, %258 : vector<8x16xf32>
    %c3_141 = arith.constant 3 : index
    %c0_142 = arith.constant 0 : index
    %c0_143 = arith.constant 0 : index
    %266 = vector.load %arg4[%c3_141, %c0_142, %c0_143] : memref<4x16x64xf32, #tpu.memory_space<vmem>>, vector<1x16x64xf32>
    %267 = vector.shape_cast %266 : vector<1x16x64xf32> to vector<16x64xf32>
    %cst_144 = arith.constant dense<0.000000e+00> : vector<8x64xf32>
    %268 = tpu.matmul %265, %267, %cst_144 {dimension_numbers = #tpu.dot_dimension_numbers<[1], [0], [0], [1], [0, 0, 1, 1], [], []>} : vector<8x16xf32>, vector<16x64xf32>, vector<8x64xf32> -> vector<8x64xf32>
    %c3_145 = arith.constant 3 : index
    %c0_146 = arith.constant 0 : index
    %c0_147 = arith.constant 0 : index
    %269 = vector.load %arg5[%c3_145, %c0_146, %c0_147] : memref<4x1x64xf32, #tpu.memory_space<vmem>>, vector<1x1x64xf32>
    %270 = vector.shape_cast %269 : vector<1x1x64xf32> to vector<1x64xf32>
    %271 = vector.broadcast %270 : vector<1x64xf32> to vector<8x64xf32>
    %272 = arith.addf %268, %271 : vector<8x64xf32>
    %273 = vector.extract_strided_slice %272 {offsets = [0, 0], sizes = [8, 32], strides = [1, 1]} : vector<8x64xf32> to vector<8x32xf32>
    %cst_148 = arith.constant dense<0.000000e+00> : vector<8xf32>
    %274 = vector.multi_reduction <add>, %273, %cst_148 [1] : vector<8x32xf32> to vector<8xf32>
    %275 = vector.shape_cast %274 : vector<8xf32> to vector<8x1xf32>
    %cst_149 = arith.constant 3.200000e+01 : f32
    %276 = vector.broadcast %cst_149 : f32 to vector<8x1xf32>
    %277 = arith.divf %275, %276 : vector<8x1xf32>
    %278 = arith.mulf %273, %273 : vector<8x32xf32>
    %cst_150 = arith.constant dense<0.000000e+00> : vector<8xf32>
    %279 = vector.multi_reduction <add>, %278, %cst_150 [1] : vector<8x32xf32> to vector<8xf32>
    %280 = vector.shape_cast %279 : vector<8xf32> to vector<8x1xf32>
    %cst_151 = arith.constant 3.200000e+01 : f32
    %281 = vector.broadcast %cst_151 : f32 to vector<8x1xf32>
    %282 = arith.divf %280, %281 : vector<8x1xf32>
    %283 = arith.mulf %277, %277 : vector<8x1xf32>
    %284 = arith.subf %282, %283 : vector<8x1xf32>
    %285 = vector.broadcast %277 : vector<8x1xf32> to vector<8x32xf32>
    %286 = arith.subf %273, %285 : vector<8x32xf32>
    %cst_152 = arith.constant 9.99999974E-6 : f32
    %287 = vector.broadcast %cst_152 : f32 to vector<8x1xf32>
    %288 = arith.addf %284, %287 : vector<8x1xf32>
    %289 = math.rsqrt %288 : vector<8x1xf32>
    %290 = vector.broadcast %289 : vector<8x1xf32> to vector<8x32xf32>
    %291 = arith.mulf %286, %290 : vector<8x32xf32>
    %c6 = arith.constant 6 : index
    %c0_153 = arith.constant 0 : index
    %c0_154 = arith.constant 0 : index
    %292 = vector.load %arg6[%c6, %c0_153, %c0_154] : memref<8x1x32xf32, #tpu.memory_space<vmem>>, vector<1x1x32xf32>
    %293 = vector.shape_cast %292 : vector<1x1x32xf32> to vector<1x32xf32>
    %294 = vector.broadcast %293 : vector<1x32xf32> to vector<8x32xf32>
    %295 = arith.mulf %291, %294 : vector<8x32xf32>
    %c6_155 = arith.constant 6 : index
    %c0_156 = arith.constant 0 : index
    %c0_157 = arith.constant 0 : index
    %296 = vector.load %arg7[%c6_155, %c0_156, %c0_157] : memref<8x1x32xf32, #tpu.memory_space<vmem>>, vector<1x1x32xf32>
    %297 = vector.shape_cast %296 : vector<1x1x32xf32> to vector<1x32xf32>
    %298 = vector.broadcast %297 : vector<1x32xf32> to vector<8x32xf32>
    %299 = arith.addf %295, %298 : vector<8x32xf32>
    %cst_158 = arith.constant 0.000000e+00 : f32
    %300 = vector.broadcast %cst_158 : f32 to vector<8x32xf32>
    %301 = arith.maximumf %299, %300 : vector<8x32xf32>
    %c6_159 = arith.constant 6 : index
    %c0_160 = arith.constant 0 : index
    %c0_161 = arith.constant 0 : index
    %302 = vector.load %arg8[%c6_159, %c0_160, %c0_161] : memref<8x32x16xf32, #tpu.memory_space<vmem>>, vector<1x32x16xf32>
    %303 = vector.shape_cast %302 : vector<1x32x16xf32> to vector<32x16xf32>
    %cst_162 = arith.constant dense<0.000000e+00> : vector<8x16xf32>
    %304 = tpu.matmul %301, %303, %cst_162 {dimension_numbers = #tpu.dot_dimension_numbers<[1], [0], [0], [1], [0, 0, 1, 1], [], []>} : vector<8x32xf32>, vector<32x16xf32>, vector<8x16xf32> -> vector<8x16xf32>
    %c6_163 = arith.constant 6 : index
    %c0_164 = arith.constant 0 : index
    %c0_165 = arith.constant 0 : index
    %305 = vector.load %arg9[%c6_163, %c0_164, %c0_165] : memref<8x1x16xf32, #tpu.memory_space<vmem>>, vector<1x1x16xf32>
    %306 = vector.shape_cast %305 : vector<1x1x16xf32> to vector<1x16xf32>
    %307 = vector.broadcast %306 : vector<1x16xf32> to vector<8x16xf32>
    %308 = arith.addf %304, %307 : vector<8x16xf32>
    %309 = vector.extract_strided_slice %272 {offsets = [0, 32], sizes = [8, 32], strides = [1, 1]} : vector<8x64xf32> to vector<8x32xf32>
    %cst_166 = arith.constant dense<0.000000e+00> : vector<8xf32>
    %310 = vector.multi_reduction <add>, %309, %cst_166 [1] : vector<8x32xf32> to vector<8xf32>
    %311 = vector.shape_cast %310 : vector<8xf32> to vector<8x1xf32>
    %cst_167 = arith.constant 3.200000e+01 : f32
    %312 = vector.broadcast %cst_167 : f32 to vector<8x1xf32>
    %313 = arith.divf %311, %312 : vector<8x1xf32>
    %314 = arith.mulf %309, %309 : vector<8x32xf32>
    %cst_168 = arith.constant dense<0.000000e+00> : vector<8xf32>
    %315 = vector.multi_reduction <add>, %314, %cst_168 [1] : vector<8x32xf32> to vector<8xf32>
    %316 = vector.shape_cast %315 : vector<8xf32> to vector<8x1xf32>
    %cst_169 = arith.constant 3.200000e+01 : f32
    %317 = vector.broadcast %cst_169 : f32 to vector<8x1xf32>
    %318 = arith.divf %316, %317 : vector<8x1xf32>
    %319 = arith.mulf %313, %313 : vector<8x1xf32>
    %320 = arith.subf %318, %319 : vector<8x1xf32>
    %321 = vector.broadcast %313 : vector<8x1xf32> to vector<8x32xf32>
    %322 = arith.subf %309, %321 : vector<8x32xf32>
    %cst_170 = arith.constant 9.99999974E-6 : f32
    %323 = vector.broadcast %cst_170 : f32 to vector<8x1xf32>
    %324 = arith.addf %320, %323 : vector<8x1xf32>
    %325 = math.rsqrt %324 : vector<8x1xf32>
    %326 = vector.broadcast %325 : vector<8x1xf32> to vector<8x32xf32>
    %327 = arith.mulf %322, %326 : vector<8x32xf32>
    %c7 = arith.constant 7 : index
    %c0_171 = arith.constant 0 : index
    %c0_172 = arith.constant 0 : index
    %328 = vector.load %arg6[%c7, %c0_171, %c0_172] : memref<8x1x32xf32, #tpu.memory_space<vmem>>, vector<1x1x32xf32>
    %329 = vector.shape_cast %328 : vector<1x1x32xf32> to vector<1x32xf32>
    %330 = vector.broadcast %329 : vector<1x32xf32> to vector<8x32xf32>
    %331 = arith.mulf %327, %330 : vector<8x32xf32>
    %c7_173 = arith.constant 7 : index
    %c0_174 = arith.constant 0 : index
    %c0_175 = arith.constant 0 : index
    %332 = vector.load %arg7[%c7_173, %c0_174, %c0_175] : memref<8x1x32xf32, #tpu.memory_space<vmem>>, vector<1x1x32xf32>
    %333 = vector.shape_cast %332 : vector<1x1x32xf32> to vector<1x32xf32>
    %334 = vector.broadcast %333 : vector<1x32xf32> to vector<8x32xf32>
    %335 = arith.addf %331, %334 : vector<8x32xf32>
    %cst_176 = arith.constant 0.000000e+00 : f32
    %336 = vector.broadcast %cst_176 : f32 to vector<8x32xf32>
    %337 = arith.maximumf %335, %336 : vector<8x32xf32>
    %c7_177 = arith.constant 7 : index
    %c0_178 = arith.constant 0 : index
    %c0_179 = arith.constant 0 : index
    %338 = vector.load %arg8[%c7_177, %c0_178, %c0_179] : memref<8x32x16xf32, #tpu.memory_space<vmem>>, vector<1x32x16xf32>
    %339 = vector.shape_cast %338 : vector<1x32x16xf32> to vector<32x16xf32>
    %cst_180 = arith.constant dense<0.000000e+00> : vector<8x16xf32>
    %340 = tpu.matmul %337, %339, %cst_180 {dimension_numbers = #tpu.dot_dimension_numbers<[1], [0], [0], [1], [0, 0, 1, 1], [], []>} : vector<8x32xf32>, vector<32x16xf32>, vector<8x16xf32> -> vector<8x16xf32>
    %c7_181 = arith.constant 7 : index
    %c0_182 = arith.constant 0 : index
    %c0_183 = arith.constant 0 : index
    %341 = vector.load %arg9[%c7_181, %c0_182, %c0_183] : memref<8x1x16xf32, #tpu.memory_space<vmem>>, vector<1x1x16xf32>
    %342 = vector.shape_cast %341 : vector<1x1x16xf32> to vector<1x16xf32>
    %343 = vector.broadcast %342 : vector<1x16xf32> to vector<8x16xf32>
    %344 = arith.addf %340, %343 : vector<8x16xf32>
    %cst_184 = arith.constant -5.000000e+00 : f32
    %cst_185 = arith.constant 5.000000e+00 : f32
    %345 = vector.broadcast %cst_184 : f32 to vector<8x16xf32>
    %346 = arith.maximumf %345, %308 : vector<8x16xf32>
    %347 = vector.broadcast %cst_185 : f32 to vector<8x16xf32>
    %348 = arith.minimumf %347, %346 : vector<8x16xf32>
    %349 = math.exp %348 : vector<8x16xf32>
    %350 = arith.mulf %179, %349 : vector<8x16xf32>
    %351 = arith.addf %350, %344 : vector<8x16xf32>
    %c0_186 = arith.constant 0 : index
    %c0_187 = arith.constant 0 : index
    %352 = vector.load %arg10[%c0_186, %c0_187] : memref<16x128xf32, #tpu.memory_space<vmem>>, vector<16x128xf32>
    %cst_188 = arith.constant dense<0.000000e+00> : vector<8x128xf32>
    %353 = tpu.matmul %265, %352, %cst_188 {dimension_numbers = #tpu.dot_dimension_numbers<[1], [0], [0], [1], [0, 0, 1, 1], [], []>} : vector<8x16xf32>, vector<16x128xf32>, vector<8x128xf32> -> vector<8x128xf32>
    %c0_189 = arith.constant 0 : index
    %c0_190 = arith.constant 0 : index
    %354 = vector.load %arg11[%c0_189, %c0_190] : memref<16x128xf32, #tpu.memory_space<vmem>>, vector<16x128xf32>
    %cst_191 = arith.constant dense<0.000000e+00> : vector<8x128xf32>
    %355 = tpu.matmul %351, %354, %cst_191 {dimension_numbers = #tpu.dot_dimension_numbers<[1], [0], [0], [1], [0, 0, 1, 1], [], []>} : vector<8x16xf32>, vector<16x128xf32>, vector<8x128xf32> -> vector<8x128xf32>
    %356 = arith.addf %353, %355 : vector<8x128xf32>
    %c0_192 = arith.constant 0 : index
    %c0_193 = arith.constant 0 : index
    %357 = vector.load %arg12[%c0_192, %c0_193] : memref<1x128xf32, #tpu.memory_space<vmem>>, vector<1x128xf32>
    %358 = vector.broadcast %357 : vector<1x128xf32> to vector<8x128xf32>
    %359 = arith.addf %356, %358 : vector<8x128xf32>
    %c0_194 = arith.constant 0 : index
    %c0_195 = arith.constant 0 : index
    %360 = vector.load %arg13[%c0_194, %c0_195] : memref<8x128xf32, #tpu.memory_space<vmem>>, vector<8x128xf32>
    tpu.vector_store %arg13[%c0_194, %c0_195], %359 {strides = array<i32>} : memref<8x128xf32, #tpu.memory_space<vmem>>, vector<8x128xf32>,
    return
  }
  func.func @transform_0(%arg0: i32) -> (i32, i32) {
    %c0_i32 = arith.constant 0 : i32
    %c0_i32_0 = arith.constant 0 : i32
    return %arg0, %c0_i32 : i32, i32
  }
  func.func @transform_1(%arg0: i32) -> (i32, i32) {
    %c0_i32 = arith.constant 0 : i32
    %c0_i32_0 = arith.constant 0 : i32
    %c0_i32_1 = arith.constant 0 : i32
    return %c0_i32, %c0_i32_0 : i32, i32
  }
  func.func @transform_2(%arg0: i32) -> (i32, i32) {
    %c0_i32 = arith.constant 0 : i32
    %c0_i32_0 = arith.constant 0 : i32
    %c0_i32_1 = arith.constant 0 : i32
    return %c0_i32, %c0_i32_0 : i32, i32
  }
  func.func @transform_3(%arg0: i32) -> (i32, i32, i32) {
    %c0_i32 = arith.constant 0 : i32
    %c0_i32_0 = arith.constant 0 : i32
    %c0_i32_1 = arith.constant 0 : i32
    %c0_i32_2 = arith.constant 0 : i32
    return %c0_i32, %c0_i32_0, %c0_i32_1 : i32, i32, i32
  }
  func.func @transform_4(%arg0: i32) -> (i32, i32, i32) {
    %c0_i32 = arith.constant 0 : i32
    %c0_i32_0 = arith.constant 0 : i32
    %c0_i32_1 = arith.constant 0 : i32
    %c0_i32_2 = arith.constant 0 : i32
    return %c0_i32, %c0_i32_0, %c0_i32_1 : i32, i32, i32
  }
  func.func @transform_5(%arg0: i32) -> (i32, i32, i32) {
    %c0_i32 = arith.constant 0 : i32
    %c0_i32_0 = arith.constant 0 : i32
    %c0_i32_1 = arith.constant 0 : i32
    %c0_i32_2 = arith.constant 0 : i32
    return %c0_i32, %c0_i32_0, %c0_i32_1 : i32, i32, i32
  }
  func.func @transform_6(%arg0: i32) -> (i32, i32, i32) {
    %c0_i32 = arith.constant 0 : i32
    %c0_i32_0 = arith.constant 0 : i32
    %c0_i32_1 = arith.constant 0 : i32
    %c0_i32_2 = arith.constant 0 : i32
    return %c0_i32, %c0_i32_0, %c0_i32_1 : i32, i32, i32
  }
  func.func @transform_7(%arg0: i32) -> (i32, i32, i32) {
    %c0_i32 = arith.constant 0 : i32
    %c0_i32_0 = arith.constant 0 : i32
    %c0_i32_1 = arith.constant 0 : i32
    %c0_i32_2 = arith.constant 0 : i32
    return %c0_i32, %c0_i32_0, %c0_i32_1 : i32, i32, i32
  }
  func.func @transform_8(%arg0: i32) -> (i32, i32, i32) {
    %c0_i32 = arith.constant 0 : i32
    %c0_i32_0 = arith.constant 0 : i32
    %c0_i32_1 = arith.constant 0 : i32
    %c0_i32_2 = arith.constant 0 : i32
    return %c0_i32, %c0_i32_0, %c0_i32_1 : i32, i32, i32
  }
  func.func @transform_9(%arg0: i32) -> (i32, i32) {
    %c0_i32 = arith.constant 0 : i32
    %c0_i32_0 = arith.constant 0 : i32
    %c0_i32_1 = arith.constant 0 : i32
    return %c0_i32, %c0_i32_0 : i32, i32
  }
  func.func @transform_10(%arg0: i32) -> (i32, i32) {
    %c0_i32 = arith.constant 0 : i32
    %c0_i32_0 = arith.constant 0 : i32
    %c0_i32_1 = arith.constant 0 : i32
    return %c0_i32, %c0_i32_0 : i32, i32
  }
  func.func @transform_11(%arg0: i32) -> (i32, i32) {
    %c0_i32 = arith.constant 0 : i32
    %c0_i32_0 = arith.constant 0 : i32
    %c0_i32_1 = arith.constant 0 : i32
    return %c0_i32, %c0_i32_0 : i32, i32
  }
  func.func @transform_12(%arg0: i32) -> (i32, i32) {
    %c0_i32 = arith.constant 0 : i32
    %c0_i32_0 = arith.constant 0 : i32
    return %arg0, %c0_i32 : i32, i32
  }
}

</mosaic_0001>

<bundles_post_ra>
// kernel: frequency_model_forward.1
= control target key start
LH: loop header
LB: loop body
LE: loop exit
PB: predicated region body
PF: predicated region fallthrough
CT: control target
= control target key end

     0   :  { %vm49_vm0 = vcmask 130048   ;;  %s1517_s0 = inlined_call_operand.vmem [shape: f32[8,16], index: 0, kind: input, shape index: {}]   ;;  %s1518_s1 = inlined_call_operand.vmem [shape: f32[16,32], index: 1, kind: input, shape index: {}]   ;;  %s1519_s2 = inlined_call_operand.vmem [shape: f32[1,32], index: 2, kind: input, shape index: {}]   ;;  %s1520_s3 = inlined_call_operand.vmem [shape: f32[4,16,64], index: 3, kind: input, shape index: {}]   ;;  %s1521_s4 = inlined_call_operand.vmem [shape: f32[4,1,64], index: 4, kind: input, shape index: {}]   ;;  %s1522_s5 = inlined_call_operand.vmem [shape: f32[8,1,32], index: 5, kind: input, shape index: {}]   ;;  %s1523_s6 = inlined_call_operand.vmem [shape: f32[8,1,32], index: 6, kind: input, shape index: {}]   ;;  %s1524_s7 = inlined_call_operand.vmem [shape: f32[8,32,16], index: 7, kind: input, shape index: {}]   ;;  %s1525_s8 = inlined_call_operand.vmem [shape: f32[8,1,16], index: 8, kind: input, shape index: {}]   ;;  %s1526_s9 = inlined_call_operand.vmem [shape: f32[16,128], index: 9, kind: input, shape index: {}]   ;;  %s1527_s10 = inlined_call_operand.vmem [shape: f32[16,128], index: 10, kind: input, shape index: {}]   ;;  %s1528_s11 = inlined_call_operand.vmem [shape: f32[1,128], index: 11, kind: input, shape index: {}]   ;;  %s1529_s12 = inlined_call_operand.hbm [shape: f32[8,128], index: 12, kind: output, shape index: {}]  }
   0x1   :  { %v44_v0 = vld [vmem:[%s1518_s1 + $0x8] sm:$0xff]  ;;  %v43_v1 = vld [vmem:[%s1518_s1] sm:$0xff] }
   0x2   :  { %67 = vmatpush.msra.mxu0 %v44_v0  ;;  %v42_v2 = vld [vmem:[%s1517_s0] sm:$0xff] }
   0x4   :  { %68 = vmatpush.msra.mxu0 %v43_v1 }
   0x5   :  { %926 = vmatmul.msk.f32.vlgmr.msra.gmra.mxu0 %vm49_vm0, %v42_v2 }
   0x6   :  { %17 = vsyncpa [#allocation3], 0  ;;  %v74_v3 = vld [vmem:[%s1520_s3 + $0x8] sm:$0xff]  ;;  %v73_v4 = vld [vmem:[%s1520_s3] sm:$0xff]  ;;  %s1091_s0 = smov 112   ;;  %vm104_vm1 = vcmask 261120  }
   0x7   :  { %98 = vmatpush.msra.mxu1 %v74_v3  ;;  %v1009_v5 = vld [vmem:[%s1519_s2] ss:$0 sm:$0xff]  ;;  %s1092_s16 = smov 96   ;;  %v1011_v14 = vld [vmem:[%s1522_s5 + $0x1] ss:$0 sm:$0xff]  ;;  %s1093_s18 = smov 32  }
   0x8   :  { %v1010_v9 = vld [vmem:[%s1521_s4] ss:$0 sm:$0xff]  ;;  %v1094_v20 = vmov 32.0   ;;  %v1012_v23 = vld [vmem:[%s1523_s6 + $0x1] ss:$0 sm:$0xff]  ;;  %v150_v27 = vld [vmem:[%s1524_s7 + $0x18] sm:$0xff] }
   0x9   :  { %99 = vmatpush.msra.mxu1 %v73_v4  ;;  %1039 = vrcp.f32 %v1094_v20  ;;  %v149_v28 = vld [vmem:[%s1524_s7 + $0x10] sm:$0xff]  ;;  %170 = vmatpush.msra.mxu2 %v150_v27  ;;  %v148_v29 = vld [vmem:[%s1524_s7 + $0x8] sm:$0xff]  ;;  %v147_v32 = vld [vmem:[%s1524_s7] sm:$0xff]  ;;  %s1095_s23 = smov 16   ;;  %s1096_s22 = smov [#allocation2]  }
   0xa   :  { %v1013_v46 = vld [vmem:[%s1522_s5] ss:$0 sm:$0xff] }
   0xb   :  { %171 = vmatpush.msra.mxu2 %v149_v28  ;;  %v1014_v49 = vld [vmem:[%s1523_s6] ss:$0 sm:$0xff] }
   0xd   :  { %172 = vmatpush.msra.mxu2 %v148_v29  ;;  %v1017_v29 = vld [vmem:[%s1521_s4 + $0x1] ss:$0 sm:$0xff] }
   0xf   :  { %v1040_v21 = vpop.eup %1039  ;;  %173 = vmatpush.msra.mxu2 %v147_v32 }
  0x10   :  { %v109_v22 = vmul.f32 32.0, %v1040_v21  ;;  %vm113_vm2 = vweird.f32 %v1040_v21 }
  0x12   :  { %v110_v24 = vsub.f32 1.0, %v109_v22 }
  0x14   :  { %v111_v25 = vmul.f32 %v1040_v21, %v110_v24 }
  0x16   :  { %v112_v26 = vadd.f32 %v1040_v21, %v111_v25 }
  0x18   :  { %v1218_v30 = vsel %vm113_vm2, %v1040_v21, %v112_v26 }
  0x82   :  { %v70_v6 = vpop.f32.mrf.mxu0 }
  0x83   :  { %v1181_v7 = vadd.f32 %v1009_v5, %v70_v6 }
  0x85   :  { %80 = vrot.lane.b32.xlu0 %v1181_v7, %s1091_s0 }
  0xf7   :  { %v81_v8 = vpop.permute.xlu0 %80 }
  0xf8   :  { %927 = vmatmul.msk.f32.vlgmr.msra.gmra.mxu1 %vm49_vm0, %v81_v8 }
 0x175   :  { %v101_v10 = vpop.f32.mrf.mxu1 }
 0x176   :  { %v1189_v11 = vadd.f32 %v1010_v9, %v101_v10 }
 0x178   :  { %179 = vrot.lane.b32.xlu0 %v1189_v11, %s1092_s16  ;;  %v105_v12 = vsel %vm104_vm1, %v1189_v11, 0.0  ;;  %v116_v13 = vmul.f32 %v1189_v11, %v1189_v11 }
 0x179   :  { %106 = vadd.xlane.f32.xlu2 %v105_v12  ;;  %v934_v12 = vld [vmem:[%s1524_s7 + $0x38] sm:$0xff] }
 0x17a   :  { %187 = vrot.lane.b32.xlu1 %v116_v13, %s1092_s16  ;;  %v117_v15 = vsel %vm104_vm1, %v116_v13, 0.0  ;;  %v933_v13 = vld [vmem:[%s1524_s7 + $0x30] sm:$0xff]  ;;  %253 = vmatpush.msra.mxu3 %v934_v12 }
 0x17c   :  { %254 = vmatpush.msra.mxu3 %v933_v13  ;;  %v953_v13 = vld [vmem:[%s1524_s7 + $0x68] sm:$0xff] }
 0x191   :  { %213 = vrot.lane.b32.xlu2 %v1011_v14, %s1093_s18  ;;  %v931_v14 = vld [vmem:[%s1524_s7 + $0x20] sm:$0xff] }
 0x1a2   :  { %118 = vadd.xlane.f32.xlu0 %v117_v15  ;;  %v939_v15 = vld [vmem:[%s1520_s3 + $0x18] sm:$0xff] }
 0x1a3   :  { %292 = vmatpush.msrb.mxu0 %v939_v15 }
 0x1ea   :  { %v180_v16 = vpop.permute.xlu0 %179 }
 0x1eb   :  { %v182_v17 = vsel %vm104_vm1, %v180_v16, 0.0 }
 0x1ec   :  { %183 = vadd.xlane.f32.xlu1 %v182_v17  ;;  %v188_v18 = vpop.permute.xlu1 %187  ;;  %v107_v31 = vpop.xlane.xlu2 %106  ;;  %v938_v17 = vld [vmem:[%s1520_s3 + $0x10] sm:$0xff] }
 0x1ed   :  { %v190_v19 = vsel %vm104_vm1, %v188_v18, 0.0  ;;  %v115_v33 = vmul.f32 %v1218_v30, %v107_v31  ;;  %293 = vmatpush.msrb.mxu0 %v938_v17  ;;  %v1015_v18 = vld [vmem:[%s1525_s8] ss:$0 sm:$0xff] }
 0x1ee   :  { %191 = vadd.xlane.f32.xlu2 %v190_v19 }
 0x1ef   :  { %v121_v35 = vmul.f32 %v115_v33, %v115_v33  ;;  %v123_v45 = vsub.f32 %v1189_v11, %v115_v33 }
 0x1f4   :  { %v214_v53 = vpop.permute.xlu2 %213 }
 0x206   :  { %221 = vrot.lane.b32.xlu2 %v1012_v23, %s1093_s18  ;;  %v1016_v23 = vld [vmem:[%s1525_s8 + $0x1] ss:$0 sm:$0xff] }
 0x215   :  { %v119_v34 = vpop.xlane.xlu0 %118 }
 0x216   :  { %v120_v36 = vmul.f32 %v119_v34, %v1218_v30  ;;  %v1018_v34 = vld [vmem:[%s1523_s6 + $0x3] ss:$0 sm:$0xff] }
 0x218   :  { %v122_v37 = vsub.f32 %v120_v36, %v121_v35 }
 0x21a   :  { %v124_v38 = vadd.f32 1e-05, %v122_v37 }
 0x21c   :  { %1041 = vrsqrt.f32 %v124_v38  ;;  %vm131_vm4 = vweird.f32 %v124_v38 }
 0x222   :  { %v1042_v39 = vpop.eup %1041 }
 0x223   :  { %v126_v40 = vmul.f32 %v1042_v39, %v124_v38  ;;  %vm132_vm3 = vweird.f32 %v1042_v39 }
 0x224   :  { %vm133_vm5 = vmor %vm131_vm4, %vm132_vm3 }
 0x225   :  { %v127_v41 = vmul.f32 %v1042_v39, %v126_v40  ;;  %v1019_v40 = vld [vmem:[%s1522_s5 + $0x3] ss:$0 sm:$0xff] }
 0x227   :  { %v128_v42 = vmul.f32 0.5, %v127_v41 }
 0x229   :  { %v129_v43 = vsub.f32 1.5, %v128_v42 }
 0x22b   :  { %v130_v44 = vmul.f32 %v1042_v39, %v129_v43 }
 0x22d   :  { %v134_v47 = vsel %vm133_vm5, %v1042_v39, %v130_v44 }
 0x22e   :  { %v135_v48 = vmul.f32 %v134_v47, %v123_v45 }
 0x230   :  { %v140_v50 = vmul.f32 %v1013_v46, %v135_v48 }
 0x232   :  { %v145_v51 = vadd.f32 %v1014_v49, %v140_v50 }
 0x234   :  { %v146_v52 = vmax.f32 %v145_v51, 0.0 }
 0x236   :  { %928 = vmatmul.msk.f32.vlgmr.msra.gmra.mxu2 %vm104_vm1, %v146_v52 }
 0x25f   :  { %v184_v54 = vpop.xlane.xlu1 %183 }
 0x260   :  { %v185_v55 = vmul.f32 %v184_v54, %v1218_v30 }
 0x261   :  { %v192_v56 = vpop.xlane.xlu2 %191 }
 0x262   :  { %v194_v57 = vmul.f32 %v185_v55, %v185_v55  ;;  %v193_v58 = vmul.f32 %v192_v56, %v1218_v30  ;;  %v196_v3 = vsub.f32 %v1189_v11, %v185_v55  ;;  %v932_v11 = vld [vmem:[%s1524_s7 + $0x28] sm:$0xff] }
 0x263   :  { %255 = vmatpush.msra.mxu3 %v932_v11 }
 0x264   :  { %v195_v59 = vsub.f32 %v193_v58, %v194_v57 }
 0x265   :  { %256 = vmatpush.msra.mxu3 %v931_v14  ;;  %v952_v14 = vld [vmem:[%s1524_s7 + $0x60] sm:$0xff] }
 0x266   :  { %v197_v60 = vadd.f32 1e-05, %v195_v59 }
 0x268   :  { %1043 = vrsqrt.f32 %v197_v60  ;;  %vm204_vm7 = vweird.f32 %v197_v60 }
 0x269   :  { %v222_v6 = vpop.permute.xlu2 %221 }
 0x26e   :  { %v1044_v61 = vpop.eup %1043 }
 0x26f   :  { %v199_v62 = vmul.f32 %v1044_v61, %v197_v60  ;;  %vm205_vm6 = vweird.f32 %v1044_v61 }
 0x270   :  { %vm206_vm8 = vmor %vm204_vm7, %vm205_vm6 }
 0x271   :  { %v200_v63 = vmul.f32 %v1044_v61, %v199_v62 }
 0x273   :  { %v201_v0 = vmul.f32 0.5, %v200_v63  ;;  %v947_v63 = vld [vmem:[%s1524_s7 + $0x58] sm:$0xff] }
 0x274   :  { %360 = vmatpush.msrb.mxu1 %v947_v63 }
 0x275   :  { %v202_v1 = vsub.f32 1.5, %v201_v0  ;;  %v946_v0 = vld [vmem:[%s1524_s7 + $0x50] sm:$0xff] }
 0x276   :  { %361 = vmatpush.msrb.mxu1 %v946_v0 }
 0x277   :  { %v203_v2 = vmul.f32 %v1044_v61, %v202_v1 }
 0x279   :  { %v207_v4 = vsel %vm206_vm8, %v1044_v61, %v203_v2  ;;  %v945_v2 = vld [vmem:[%s1524_s7 + $0x48] sm:$0xff] }
 0x27a   :  { %v208_v5 = vmul.f32 %v207_v4, %v196_v3  ;;  %v944_v4 = vld [vmem:[%s1524_s7 + $0x40] sm:$0xff]  ;;  %362 = vmatpush.msrb.mxu1 %v945_v2 }
 0x27b   :  { %v965_v2 = vld [vmem:[%s1524_s7 + $0x80] sm:$0xff] }
 0x27c   :  { %v216_v8 = vmul.f32 %v214_v53, %v208_v5  ;;  %363 = vmatpush.msrb.mxu1 %v944_v4 }
 0x27e   :  { %v224_v9 = vadd.f32 %v222_v6, %v216_v8 }
 0x280   :  { %v225_v10 = vmax.f32 %v224_v9, 0.0  ;;  %v955_v9 = vld [vmem:[%s1524_s7 + $0x78] sm:$0xff] }
 0x281   :  { %443 = vmatpush.msrb.mxu2 %v955_v9 }
 0x282   :  { %237 = vrot.lane.b32.xlu2 %v225_v10, %s1092_s16  ;;  %v954_v10 = vld [vmem:[%s1524_s7 + $0x70] sm:$0xff] }
 0x283   :  { %444 = vmatpush.msrb.mxu2 %v954_v10  ;;  %v976_v10 = vld [vmem:[%s1524_s7 + $0xb8] sm:$0xff] }
 0x284   :  { %643 = vmatpush.msra.mxu1 %v976_v10  ;;  %v1035_v10 = vld [vmem:[%s1523_s6 + $0x7] ss:$0 sm:$0xff] }
 0x285   :  { %445 = vmatpush.msrb.mxu2 %v953_v13 }
 0x287   :  { %446 = vmatpush.msrb.mxu2 %v952_v14  ;;  %v974_v14 = vld [vmem:[%s1524_s7 + $0xa8] sm:$0xff] }
 0x2b9   :  { %v175_v19 = vpop.f32.mrf.mxu2 }
 0x2ba   :  { %v176_v20 = vadd.f32 %v1015_v18, %v175_v19 }
 0x2bc   :  { %v937_v21 = vclamps-f32 %v176_v20, 5.0 }
 0x2be   :  { %v263_v22 = vmul.f32 1.442695, %v937_v21 }
 0x2c0   :  { %1045 = vpow2.f32 %v263_v22  ;;  %v1020_v22 = vld [vmem:[%s1522_s5 + $0x2] ss:$0 sm:$0xff] }
 0x2c6   :  { %v1046_v24 = vpop.eup %1045 }
 0x2c7   :  { %v265_v27 = vmul.f32 %v1046_v24, %v1181_v7 }
 0x2dc   :  { %v238_v16 = vpop.permute.xlu2 %237 }
 0x2dd   :  { %936 = vmatmul.msk.f32.vlgmr.msra.gmra.mxu3 %vm104_vm1, %v238_v16 }
 0x360   :  { %v258_v25 = vpop.f32.mrf.mxu3 }
 0x361   :  { %v259_v26 = vadd.f32 %v1016_v23, %v258_v25  ;;  %v1021_v25 = vld [vmem:[%s1523_s6 + $0x2] ss:$0 sm:$0xff] }
 0x363   :  { %v1263_v28 = vadd.f32 %v265_v27, %v259_v26 }
 0x365   :  { %941 = vmatmul.msk.f32.vlgmr.msrb.gmra.mxu0 %vm49_vm0, %v1263_v28 }
 0x3e2   :  { %v295_v31 = vpop.f32.mrf.mxu0 }
 0x3e3   :  { %v1270_v32 = vadd.f32 %v1017_v29, %v295_v31 }
 0x3e5   :  { %369 = vrot.lane.b32.xlu1 %v1270_v32, %s1092_s16  ;;  %v302_v33 = vmul.f32 %v1270_v32, %v1270_v32  ;;  %v298_v35 = vsel %vm104_vm1, %v1270_v32, 0.0 }
 0x3e7   :  { %377 = vrot.lane.b32.xlu2 %v302_v33, %s1092_s16  ;;  %v303_v41 = vsel %vm104_vm1, %v302_v33, 0.0 }
 0x3ed   :  { %411 = vrot.lane.b32.xlu1 %v1018_v34, %s1093_s18 }
 0x417   :  { %299 = vadd.xlane.f32.xlu1 %v298_v35 }
 0x441   :  { %v378_v36 = vpop.permute.xlu2 %377 }
 0x442   :  { %v380_v37 = vsel %vm104_vm1, %v378_v36, 0.0 }
 0x443   :  { %381 = vadd.xlane.f32.xlu2 %v380_v37 }
 0x457   :  { %v370_v38 = vpop.permute.xlu1 %369 }
 0x458   :  { %v372_v39 = vsel %vm104_vm1, %v370_v38, 0.0  ;;  %v1023_v38 = vld [vmem:[%s1525_s8 + $0x3] ss:$0 sm:$0xff] }
 0x459   :  { %373 = vadd.xlane.f32.xlu0 %v372_v39 }
 0x45f   :  { %v412_v60 = vpop.permute.xlu1 %411 }
 0x46d   :  { %403 = vrot.lane.b32.xlu0 %v1019_v40, %s1093_s18 }
 0x48a   :  { %v300_v1 = vpop.xlane.xlu1 %299 }
 0x48b   :  { %v301_v3 = vmul.f32 %v300_v1, %v1218_v30  ;;  %v966_v1 = vld [vmem:[%s1524_s7 + $0x88] sm:$0xff] }
 0x48d   :  { %v307_v6 = vmul.f32 %v301_v3, %v301_v3  ;;  %v309_v21 = vsub.f32 %v1270_v32, %v301_v3 }
 0x497   :  { %304 = vadd.xlane.f32.xlu0 %v303_v41  ;;  %v960_v41 = vld [vmem:[%s1520_s3 + $0x28] sm:$0xff] }
 0x498   :  { %492 = vmatpush.msrb.mxu3 %v960_v41  ;;  %v1028_v41 = vld [vmem:[%s1523_s6 + $0x4] ss:$0 sm:$0xff] }
 0x4b6   :  { %v382_v42 = vpop.xlane.xlu2 %381 }
 0x4b7   :  { %v383_v45 = vmul.f32 %v382_v42, %v1218_v30  ;;  %v959_v42 = vld [vmem:[%s1520_s3 + $0x20] sm:$0xff] }
 0x4b8   :  { %493 = vmatpush.msrb.mxu3 %v959_v42 }
 0x4cc   :  { %v374_v43 = vpop.xlane.xlu0 %373 }
 0x4cd   :  { %v375_v44 = vmul.f32 %v374_v43, %v1218_v30 }
 0x4cf   :  { %v384_v46 = vmul.f32 %v375_v44, %v375_v44  ;;  %v386_v55 = vsub.f32 %v1270_v32, %v375_v44  ;;  %v1022_v32 = vld [vmem:[%s1525_s8 + $0x2] ss:$0 sm:$0xff] }
 0x4d1   :  { %v385_v47 = vsub.f32 %v383_v45, %v384_v46 }
 0x4d3   :  { %v387_v48 = vadd.f32 1e-05, %v385_v47 }
 0x4d5   :  { %1047 = vrsqrt.f32 %v387_v48  ;;  %vm394_vm10 = vweird.f32 %v387_v48 }
 0x4db   :  { %v1048_v49 = vpop.eup %1047 }
 0x4dc   :  { %v389_v50 = vmul.f32 %v1048_v49, %v387_v48  ;;  %vm395_vm9 = vweird.f32 %v1048_v49  ;;  %v1024_v48 = vld [vmem:[%s1521_s4 + $0x2] ss:$0 sm:$0xff] }
 0x4dd   :  { %vm396_vm11 = vmor %vm394_vm10, %vm395_vm9 }
 0x4de   :  { %v390_v51 = vmul.f32 %v1048_v49, %v389_v50 }
 0x4df   :  { %v404_v56 = vpop.permute.xlu0 %403 }
 0x4e0   :  { %v391_v52 = vmul.f32 0.5, %v390_v51 }
 0x4e2   :  { %v392_v53 = vsub.f32 1.5, %v391_v52 }
 0x4e4   :  { %v393_v54 = vmul.f32 %v1048_v49, %v392_v53 }
 0x4e6   :  { %v397_v57 = vsel %vm396_vm11, %v1048_v49, %v393_v54  ;;  %v1026_v54 = vld [vmem:[%s1523_s6 + $0x5] ss:$0 sm:$0xff] }
 0x4e7   :  { %v398_v58 = vmul.f32 %v397_v57, %v386_v55 }
 0x4e9   :  { %v406_v59 = vmul.f32 %v404_v56, %v398_v58  ;;  %v1025_v58 = vld [vmem:[%s1522_s5 + $0x5] ss:$0 sm:$0xff] }
 0x4eb   :  { %v414_v61 = vadd.f32 %v412_v60, %v406_v59 }
 0x4ed   :  { %v415_v62 = vmax.f32 %v414_v61, 0.0  ;;  %v968_v61 = vld [vmem:[%s1524_s7 + $0x98] sm:$0xff] }
 0x4ee   :  { %560 = vmatpush.msra.mxu0 %v968_v61 }
 0x4ef   :  { %427 = vrot.lane.b32.xlu2 %v415_v62, %s1092_s16  ;;  %v967_v62 = vld [vmem:[%s1524_s7 + $0x90] sm:$0xff] }
 0x4f0   :  { %561 = vmatpush.msra.mxu0 %v967_v62 }
 0x4f2   :  { %562 = vmatpush.msra.mxu0 %v966_v1 }
 0x4f4   :  { %563 = vmatpush.msra.mxu0 %v965_v2 }
 0x50a   :  { %v305_v5 = vpop.xlane.xlu0 %304 }
 0x50b   :  { %v306_v8 = vmul.f32 %v305_v5, %v1218_v30 }
 0x50d   :  { %v308_v12 = vsub.f32 %v306_v8, %v307_v6 }
 0x50f   :  { %v310_v11 = vadd.f32 1e-05, %v308_v12  ;;  %v975_v12 = vld [vmem:[%s1524_s7 + $0xb0] sm:$0xff] }
 0x510   :  { %644 = vmatpush.msra.mxu1 %v975_v12  ;;  %v1032_v12 = vld [vmem:[%s1522_s5 + $0x7] ss:$0 sm:$0xff] }
 0x511   :  { %1049 = vrsqrt.f32 %v310_v11  ;;  %vm317_vm13 = vweird.f32 %v310_v11 }
 0x512   :  { %645 = vmatpush.msra.mxu1 %v974_v14 }
 0x517   :  { %v1050_v15 = vpop.eup %1049 }
 0x518   :  { %v312_v16 = vmul.f32 %v1050_v15, %v310_v11  ;;  %vm318_vm12 = vweird.f32 %v1050_v15 }
 0x519   :  { %vm319_vm14 = vmor %vm317_vm13, %vm318_vm12 }
 0x51a   :  { %v313_v17 = vmul.f32 %v1050_v15, %v312_v16 }
 0x51c   :  { %v314_v18 = vmul.f32 0.5, %v313_v17  ;;  %v973_v17 = vld [vmem:[%s1524_s7 + $0xa0] sm:$0xff] }
 0x51d   :  { %646 = vmatpush.msra.mxu1 %v973_v17 }
 0x51e   :  { %v315_v19 = vsub.f32 1.5, %v314_v18 }
 0x520   :  { %v316_v20 = vmul.f32 %v1050_v15, %v315_v19 }
 0x522   :  { %v320_v23 = vsel %vm319_vm14, %v1050_v15, %v316_v20 }
 0x523   :  { %v321_v24 = vmul.f32 %v320_v23, %v309_v21 }
 0x525   :  { %v327_v26 = vmul.f32 %v1020_v22, %v321_v24 }
 0x527   :  { %v333_v27 = vadd.f32 %v1021_v25, %v327_v26 }
 0x529   :  { %v334_v29 = vmax.f32 %v333_v27, 0.0 }
 0x52b   :  { %949 = vmatmul.msk.f32.vlgmr.msrb.gmra.mxu1 %vm104_vm1, %v334_v29 }
 0x549   :  { %v428_v31 = vpop.permute.xlu2 %427 }
 0x54a   :  { %957 = vmatmul.msk.f32.vlgmr.msrb.gmra.mxu2 %vm104_vm1, %v428_v31 }
 0x5a8   :  { %v365_v33 = vpop.f32.mrf.mxu1 }
 0x5a9   :  { %v366_v34 = vadd.f32 %v1022_v32, %v365_v33 }
 0x5ab   :  { %v958_v35 = vclamps-f32 %v366_v34, 5.0  ;;  %v1027_v34 = vld [vmem:[%s1522_s5 + $0x4] ss:$0 sm:$0xff] }
 0x5ad   :  { %v453_v36 = vmul.f32 1.442695, %v958_v35 }
 0x5af   :  { %1051 = vpow2.f32 %v453_v36 }
 0x5b5   :  { %v1052_v37 = vpop.eup %1051 }
 0x5b6   :  { %456 = vrot.lane.b32.xlu1 %v1052_v37, %s1095_s23 }
 0x5cd   :  { %v448_v39 = vpop.f32.mrf.mxu2 }
 0x5ce   :  { %v449_v40 = vadd.f32 %v1023_v38, %v448_v39 }
 0x5d0   :  { %461 = vrot.lane.b32.xlu0 %v449_v40, %s1095_s23 }
 0x628   :  { %v457_v43 = vpop.permute.xlu1 %456 }
 0x629   :  { %v459_v44 = vmul.f32 %v457_v43, %v1181_v7 }
 0x642   :  { %v462_v45 = vpop.permute.xlu0 %461 }
 0x643   :  { %v1344_v46 = vadd.f32 %v462_v45, %v459_v44 }
 0x645   :  { %474 = vrot.lane.b32.xlu2 %v1344_v46, %s1091_s0 }
 0x69f   :  { %v475_v47 = vpop.permute.xlu2 %474 }
 0x6a0   :  { %962 = vmatmul.msk.f32.vlgmr.msrb.gmra.mxu3 %vm49_vm0, %v475_v47 }
 0x723   :  { %v495_v49 = vpop.f32.mrf.mxu3 }
 0x724   :  { %v1352_v50 = vadd.f32 %v1024_v48, %v495_v49  ;;  %v981_v49 = vld [vmem:[%s1520_s3 + $0x38] sm:$0xff] }
 0x725   :  { %682 = vmatpush.msra.mxu2 %v981_v49 }
 0x726   :  { %569 = vrot.lane.b32.xlu2 %v1352_v50, %s1092_s16  ;;  %v502_v7 = vmul.f32 %v1352_v50, %v1352_v50  ;;  %v498_v51 = vsel %vm104_vm1, %v1352_v50, 0.0 }
 0x728   :  { %v503_v57 = vsel %vm104_vm1, %v502_v7, 0.0 }
 0x72e   :  { %577 = vrot.lane.b32.xlu2 %v502_v7, %s1092_s16  ;;  %v980_v7 = vld [vmem:[%s1520_s3 + $0x30] sm:$0xff] }
 0x72f   :  { %683 = vmatpush.msra.mxu2 %v980_v7 }
 0x757   :  { %499 = vadd.xlane.f32.xlu2 %v498_v51  ;;  %v856_v51 = vld [vmem:[%s1526_s9 + $0x8] sm:$0xff] }
 0x758   :  { %898 = vmatpush.msrb.mxu2 %v856_v51 }
 0x76f   :  { %611 = vrot.lane.b32.xlu2 %v1026_v54, %s1093_s18 }
 0x780   :  { %v570_v52 = vpop.permute.xlu2 %569 }
 0x781   :  { %v572_v53 = vsel %vm104_vm1, %v570_v52, 0.0  ;;  %v855_v52 = vld [vmem:[%s1526_s9] sm:$0xff] }
 0x782   :  { %573 = vadd.xlane.f32.xlu0 %v572_v53  ;;  %v1029_v53 = vld [vmem:[%s1525_s8 + $0x4] ss:$0 sm:$0xff]  ;;  %899 = vmatpush.msrb.mxu2 %v855_v52 }
 0x788   :  { %v578_v55 = vpop.permute.xlu2 %577 }
 0x789   :  { %v580_v56 = vsel %vm104_vm1, %v578_v55, 0.0 }
 0x78a   :  { %581 = vadd.xlane.f32.xlu1 %v580_v56  ;;  %504 = vadd.xlane.f32.xlu0 %v503_v57 }
 0x7a3   :  { %603 = vrot.lane.b32.xlu1 %v1025_v58, %s1093_s18  ;;  %v1030_v58 = vld [vmem:[%s1525_s8 + $0x5] ss:$0 sm:$0xff] }
 0x7ca   :  { %v500_v60 = vpop.xlane.xlu2 %499 }
 0x7cb   :  { %v501_v63 = vmul.f32 %v500_v60, %v1218_v30 }
 0x7cd   :  { %v507_v5 = vmul.f32 %v501_v63, %v501_v63  ;;  %v509_v33 = vsub.f32 %v1352_v50, %v501_v63 }
 0x7d2   :  { %v612_v40 = vpop.permute.xlu2 %611 }
 0x7f5   :  { %v574_v59 = vpop.xlane.xlu0 %573 }
 0x7f6   :  { %v575_v0 = vmul.f32 %v574_v59, %v1218_v30 }
 0x7f8   :  { %v584_v6 = vmul.f32 %v575_v0, %v575_v0  ;;  %v586_v31 = vsub.f32 %v1352_v50, %v575_v0  ;;  %v1031_v0 = vld [vmem:[%s1521_s4 + $0x3] ss:$0 sm:$0xff] }
 0x7fd   :  { %v582_v3 = vpop.xlane.xlu1 %581  ;;  %v505_v4 = vpop.xlane.xlu0 %504 }
 0x7fe   :  { %v583_v8 = vmul.f32 %v582_v3, %v1218_v30  ;;  %v506_v9 = vmul.f32 %v505_v4, %v1218_v30 }
 0x800   :  { %v585_v13 = vsub.f32 %v583_v8, %v584_v6  ;;  %v508_v11 = vsub.f32 %v506_v9, %v507_v5 }
 0x802   :  { %v587_v15 = vadd.f32 1e-05, %v585_v13  ;;  %v510_v16 = vadd.f32 1e-05, %v508_v11  ;;  %v989_v13 = vld [vmem:[%s1524_s7 + $0xd8] sm:$0xff]  ;;  %v988_v11 = vld [vmem:[%s1524_s7 + $0xd0] sm:$0xff] }
 0x803   :  { %750 = vmatpush.msra.mxu3 %v989_v13 }
 0x804   :  { %1053 = vrsqrt.f32 %v587_v15  ;;  %vm594_vm3 = vweird.f32 %v587_v15  ;;  %vm517_vm4 = vweird.f32 %v510_v16 }
 0x805   :  { %1055 = vrsqrt.f32 %v510_v16  ;;  %751 = vmatpush.msra.mxu3 %v988_v11 }
 0x80a   :  { %v1054_v18 = vpop.eup %1053 }
 0x80b   :  { %v1056_v19 = vpop.eup %1055  ;;  %v589_v20 = vmul.f32 %v1054_v18, %v587_v15  ;;  %vm595_vm15 = vweird.f32 %v1054_v18 }
 0x80c   :  { %v512_v21 = vmul.f32 %v1056_v19, %v510_v16  ;;  %vm518_vm2 = vweird.f32 %v1056_v19  ;;  %vm596_vm5 = vmor %vm594_vm3, %vm595_vm15  ;;  %v987_v16 = vld [vmem:[%s1524_s7 + $0xc8] sm:$0xff] }
 0x80d   :  { %v590_v22 = vmul.f32 %v1054_v18, %v589_v20  ;;  %vm519_vm6 = vmor %vm517_vm4, %vm518_vm2  ;;  %752 = vmatpush.msra.mxu3 %v987_v16  ;;  %v1038_v16 = vld [vmem:[%s1528_s11] ss:$0 sm:$0xff] }
 0x80e   :  { %v513_v23 = vmul.f32 %v1056_v19, %v512_v21 }
 0x80f   :  { %v591_v24 = vmul.f32 0.5, %v590_v22 }
 0x810   :  { %v514_v25 = vmul.f32 0.5, %v513_v23 }
 0x811   :  { %v592_v26 = vsub.f32 1.5, %v591_v24 }
 0x812   :  { %v515_v27 = vsub.f32 1.5, %v514_v25 }
 0x813   :  { %v593_v29 = vmul.f32 %v1054_v18, %v592_v26 }
 0x814   :  { %v516_v32 = vmul.f32 %v1056_v19, %v515_v27 }
 0x815   :  { %v597_v35 = vsel %vm596_vm5, %v1054_v18, %v593_v29  ;;  %v604_v36 = vpop.permute.xlu1 %603  ;;  %v986_v18 = vld [vmem:[%s1524_s7 + $0xc0] sm:$0xff] }
 0x816   :  { %v520_v37 = vsel %vm519_vm6, %v1056_v19, %v516_v32  ;;  %v598_v38 = vmul.f32 %v597_v35, %v586_v31  ;;  %753 = vmatpush.msra.mxu3 %v986_v18  ;;  %v1033_v31 = vld [vmem:[%s1522_s5 + $0x6] ss:$0 sm:$0xff] }
 0x817   :  { %v521_v39 = vmul.f32 %v520_v37, %v509_v33 }
 0x818   :  { %v606_v42 = vmul.f32 %v604_v36, %v598_v38 }
 0x819   :  { %v527_v43 = vmul.f32 %v1027_v34, %v521_v39  ;;  %v1034_v34 = vld [vmem:[%s1523_s6 + $0x6] ss:$0 sm:$0xff] }
 0x81a   :  { %v614_v44 = vadd.f32 %v612_v40, %v606_v42 }
 0x81b   :  { %v533_v45 = vadd.f32 %v1028_v41, %v527_v43 }
 0x81c   :  { %v615_v47 = vmax.f32 %v614_v44, 0.0 }
 0x81d   :  { %v534_v48 = vmax.f32 %v533_v45, 0.0 }
 0x81e   :  { %627 = vrot.lane.b32.xlu0 %v615_v47, %s1092_s16 }
 0x81f   :  { %970 = vmatmul.msk.f32.vlgmr.msra.gmra.mxu0 %vm104_vm1, %v534_v48 }
 0x890   :  { %v628_v50 = vpop.permute.xlu0 %627 }
 0x891   :  { %978 = vmatmul.msk.f32.vlgmr.msra.gmra.mxu1 %vm104_vm1, %v628_v50 }
 0x89c   :  { %v565_v54 = vpop.f32.mrf.mxu0 }
 0x89d   :  { %v566_v55 = vadd.f32 %v1029_v53, %v565_v54 }
 0x89f   :  { %v979_v56 = vclamps-f32 %v566_v55, 5.0 }
 0x8a1   :  { %v653_v57 = vmul.f32 1.442695, %v979_v56 }
 0x8a3   :  { %1057 = vpow2.f32 %v653_v57 }
 0x8a9   :  { %v1058_v59 = vpop.eup %1057 }
 0x8aa   :  { %v655_v62 = vmul.f32 %v1058_v59, %v1263_v28  ;;  %v997_v59 = vld [vmem:[%s1524_s7 + $0xf8] sm:$0xff] }
 0x8ab   :  { %833 = vmatpush.msrb.mxu0 %v997_v59 }
 0x90e   :  { %v648_v60 = vpop.f32.mrf.mxu1 }
 0x90f   :  { %v649_v61 = vadd.f32 %v1030_v58, %v648_v60  ;;  %v996_v60 = vld [vmem:[%s1524_s7 + $0xf0] sm:$0xff] }
 0x910   :  { %834 = vmatpush.msrb.mxu0 %v996_v60 }
 0x911   :  { %v656_v63 = vadd.f32 %v655_v62, %v649_v61  ;;  %v995_v61 = vld [vmem:[%s1524_s7 + $0xe8] sm:$0xff]  ;;  %v994_v62 = vld [vmem:[%s1524_s7 + $0xe0] sm:$0xff] }
 0x912   :  { %835 = vmatpush.msrb.mxu0 %v995_v61 }
 0x913   :  { %983 = vmatmul.msk.f32.vlgmr.msra.gmra.mxu2 %vm49_vm0, %v656_v63 }
 0x914   :  { %836 = vmatpush.msrb.mxu0 %v994_v62 }
 0x91b   :  { %1002 = vmatmul.msk.f32.vlgmr.msrb.gmra.mxu2 %vm49_vm0, %v656_v63  ;;  %v1036_v63 = vld [vmem:[%s1525_s8 + $0x6] ss:$0 sm:$0xff] }
 0x996   :  { %v685_v1 = vpop.f32.mrf.mxu2 }
 0x997   :  { %v1435_v2 = vadd.f32 %v1031_v0, %v685_v1 }
 0x999   :  { %759 = vrot.lane.b32.xlu1 %v1435_v2, %s1092_s16  ;;  %v692_v3 = vmul.f32 %v1435_v2, %v1435_v2  ;;  %v688_v4 = vsel %vm104_vm1, %v1435_v2, 0.0 }
 0x99b   :  { %767 = vrot.lane.b32.xlu0 %v692_v3, %s1092_s16  ;;  %v693_v28 = vsel %vm104_vm1, %v692_v3, 0.0 }
 0x99c   :  { %694 = vadd.xlane.f32.xlu2 %v693_v28 }
 0x9c5   :  { %689 = vadd.xlane.f32.xlu0 %v688_v4 }
 0xa0b   :  { %v760_v5 = vpop.permute.xlu1 %759 }
 0xa0c   :  { %v762_v6 = vsel %vm104_vm1, %v760_v5, 0.0  ;;  %v1037_v5 = vld [vmem:[%s1525_s8 + $0x7] ss:$0 sm:$0xff] }
 0xa0d   :  { %v768_v8 = vpop.permute.xlu0 %767  ;;  %763 = vadd.xlane.f32.xlu2 %v762_v6 }
 0xa0e   :  { %v770_v9 = vsel %vm104_vm1, %v768_v8, 0.0 }
 0xa0f   :  { %771 = vadd.xlane.f32.xlu1 %v770_v9  ;;  %v695_v14 = vpop.xlane.xlu2 %694  ;;  %v858_v9 = vld [vmem:[%s1527_s10 + $0x8] sm:$0xff] }
 0xa10   :  { %v696_v19 = vmul.f32 %v695_v14, %v1218_v30  ;;  %878 = vmatpush.msrb.mxu1 %v858_v9 }
 0xa25   :  { %801 = vrot.lane.b32.xlu2 %v1035_v10, %s1093_s18  ;;  %v857_v10 = vld [vmem:[%s1527_s10] sm:$0xff]  ;;  %s915_s10 = sshll.u32 %s1096_s22, 4  ;;  %s916_s10 = int_to_ptr.vmem [resolvable:$true] %s915_s10 }
 0xa26   :  { %879 = vmatpush.msrb.mxu1 %v857_v10 }
 0xa28   :  { %793 = vrot.lane.b32.xlu1 %v1032_v12, %s1093_s18  ;;  %s917_s18 = sshll.u32 %s1529_s12, 4  ;;  %s918_s18 = int_to_ptr.hbm [resolvable:$true] %s917_s18 }
 0xa38   :  { %v690_v15 = vpop.xlane.xlu0 %689 }
 0xa39   :  { %v691_v17 = vmul.f32 %v690_v15, %v1218_v30 }
 0xa3b   :  { %v697_v20 = vmul.f32 %v691_v17, %v691_v17  ;;  %v699_v32 = vsub.f32 %v1435_v2, %v691_v17  ;;  %v901_v17 = vpop.f32.mrf.mxu2 }
 0xa3d   :  { %v698_v21 = vsub.f32 %v696_v19, %v697_v20 }
 0xa3f   :  { %v700_v22 = vadd.f32 1e-05, %v698_v21 }
 0xa41   :  { %1059 = vrsqrt.f32 %v700_v22  ;;  %vm707_vm8 = vweird.f32 %v700_v22 }
 0xa47   :  { %v1060_v23 = vpop.eup %1059 }
 0xa48   :  { %v702_v24 = vmul.f32 %v1060_v23, %v700_v22  ;;  %vm708_vm7 = vweird.f32 %v1060_v23 }
 0xa49   :  { %vm709_vm9 = vmor %vm707_vm8, %vm708_vm7 }
 0xa4a   :  { %v703_v25 = vmul.f32 %v1060_v23, %v702_v24 }
 0xa4c   :  { %v704_v26 = vmul.f32 0.5, %v703_v25 }
 0xa4e   :  { %v705_v27 = vsub.f32 1.5, %v704_v26 }
 0xa50   :  { %v706_v29 = vmul.f32 %v1060_v23, %v705_v27 }
 0xa52   :  { %v710_v33 = vsel %vm709_vm9, %v1060_v23, %v706_v29 }
 0xa53   :  { %v711_v35 = vmul.f32 %v710_v33, %v699_v32 }
 0xa55   :  { %v717_v36 = vmul.f32 %v1033_v31, %v711_v35 }
 0xa57   :  { %v723_v37 = vadd.f32 %v1034_v34, %v717_v36 }
 0xa59   :  { %v724_v38 = vmax.f32 %v723_v37, 0.0 }
 0xa5b   :  { %991 = vmatmul.msk.f32.vlgmr.msra.gmra.mxu3 %vm104_vm1, %v724_v38 }
 0xa80   :  { %v764_v39 = vpop.xlane.xlu2 %763 }
 0xa81   :  { %v765_v40 = vmul.f32 %v764_v39, %v1218_v30 }
 0xa82   :  { %v772_v41 = vpop.xlane.xlu1 %771 }
 0xa83   :  { %v774_v42 = vmul.f32 %v765_v40, %v765_v40  ;;  %v773_v43 = vmul.f32 %v772_v41, %v1218_v30  ;;  %v776_v52 = vsub.f32 %v1435_v2, %v765_v40 }
 0xa85   :  { %v775_v44 = vsub.f32 %v773_v43, %v774_v42 }
 0xa87   :  { %v777_v45 = vadd.f32 1e-05, %v775_v44 }
 0xa88   :  { %v802_v56 = vpop.permute.xlu2 %801 }
 0xa89   :  { %1061 = vrsqrt.f32 %v777_v45  ;;  %vm784_vm11 = vweird.f32 %v777_v45 }
 0xa8f   :  { %v1062_v47 = vpop.eup %1061 }
 0xa90   :  { %v779_v48 = vmul.f32 %v1062_v47, %v777_v45  ;;  %vm785_vm10 = vweird.f32 %v1062_v47 }
 0xa91   :  { %vm786_vm12 = vmor %vm784_vm11, %vm785_vm10 }
 0xa92   :  { %v780_v49 = vmul.f32 %v1062_v47, %v779_v48 }
 0xa94   :  { %v781_v50 = vmul.f32 0.5, %v780_v49 }
 0xa96   :  { %v782_v7 = vsub.f32 1.5, %v781_v50 }
 0xa98   :  { %v783_v51 = vmul.f32 %v1062_v47, %v782_v7 }
 0xa9a   :  { %v794_v53 = vpop.permute.xlu1 %793  ;;  %v787_v54 = vsel %vm786_vm12, %v1062_v47, %v783_v51 }
 0xa9b   :  { %v788_v55 = vmul.f32 %v787_v54, %v776_v52 }
 0xa9d   :  { %v796_v57 = vmul.f32 %v794_v53, %v788_v55 }
 0xa9f   :  { %v804_v30 = vadd.f32 %v802_v56, %v796_v57 }
 0xaa1   :  { %v805_v58 = vmax.f32 %v804_v30, 0.0 }
 0xaa3   :  { %817 = vrot.lane.b32.xlu0 %v805_v58, %s1092_s16 }
 0xade   :  { %v755_v0 = vpop.f32.mrf.mxu3 }
 0xadf   :  { %v756_v1 = vadd.f32 %v1036_v63, %v755_v0 }
 0xae1   :  { %v1000_v2 = vclamps-f32 %v756_v1, 5.0 }
 0xae3   :  { %v843_v3 = vmul.f32 1.442695, %v1000_v2 }
 0xae5   :  { %1063 = vpow2.f32 %v843_v3 }
 0xaeb   :  { %v1064_v28 = vpop.eup %1063 }
 0xaec   :  { %846 = vrot.lane.b32.xlu0 %v1064_v28, %s1095_s23 }
 0xb15   :  { %v818_v4 = vpop.permute.xlu0 %817 }
 0xb16   :  { %999 = vmatmul.msk.f32.vlgmr.msrb.gmra.mxu0 %vm104_vm1, %v818_v4 }
 0xb5e   :  { %v847_v12 = vpop.permute.xlu0 %846 }
 0xb5f   :  { %v849_v13 = vmul.f32 %v847_v12, %v1344_v46 }
 0xb93   :  { %v838_v6 = vpop.f32.mrf.mxu0 }
 0xb94   :  { %v839_v8 = vadd.f32 %v1037_v5, %v838_v6 }
 0xb96   :  { %851 = vrot.lane.b32.xlu2 %v839_v8, %s1095_s23 }
 0xbf0   :  { %v852_v11 = vpop.permute.xlu2 %851 }
 0xbf1   :  { %v854_v14 = vadd.f32 %v852_v11, %v849_v13 }
 0xbf3   :  { %860 = vrot.lane.b32.xlu1 %v854_v14, %s1091_s0 }
 0xc65   :  { %v861_v15 = vpop.permute.xlu1 %860 }
 0xc66   :  { %1001 = vmatmul.msk.f32.vlgmr.msrb.gmra.mxu1 %vm49_vm0, %v861_v15 }
 0xce3   :  { %v881_v18 = vpop.f32.mrf.mxu1 }
 0xce4   :  { %v902_v46 = vadd.f32 %v901_v17, %v881_v18 }
 0xce6   :  { %v908_v19 = vadd.f32 %v1038_v16, %v902_v46 }
 0xce8   :  { %909 = vst [vmem:[#allocation2] sm:$0xff] %v908_v19 }
 0xce9   :  { %920 = dma.vmem_to_hbm [thread:$0]  %s916_s10, 128, %s918_s18, [#allocation3]  }
 0xcea   :  { %1089 = dma.done.wait [#allocation3], 128  }
 0xceb   :  { %1090 = vsyncadd [#allocation3], 4294967168 }
 0xcec   :  { %925 = vsyncpa [#allocation3], 1 }

</bundles_post_ra>
